<compile_context>
chip_gen: v6e
topology: v6e:2x2x1
jax: 0.10.0
libtpu: 0.0.40
codegen_flags: <defaults>
</compile_context>

<pallas_src>
import functools

import jax
import jax.numpy as jnp
from jax import lax
from jax.experimental import pallas as pl
from jax.experimental.pallas import tpu as pltpu


def _round_up(x, m):
    return (x + m - 1) // m * m


def _sublanes(dtype):
    # sublanes per native tile: 8 for f32, 16 for bf16, 32 for int8/fp8
    return 8 * 4 // jnp.dtype(dtype).itemsize


def _vmem_budget():
    """Generation-aware VMEM budgets (v5e/v6e: 128 MiB, v7x: 64 MiB per TC)."""
    cap = 64 * 1024 * 1024            # conservative fallback = v7x per-TC VMEM
    try:
        info = pltpu.get_tpu_info()
        cap = int(getattr(info, "vmem_capacity_bytes", cap) or cap)
    except Exception:
        pass
    cap = max(cap, 32 * 1024 * 1024)
    tile_budget = int(cap * 0.30)                           # row-tile working set
    vmem_limit = min(int(cap * 0.70), 112 * 1024 * 1024)    # leave Mosaic headroom
    vmem_limit = max(vmem_limit, 32 * 1024 * 1024)
    return tile_budget, vmem_limit


def _auto_row_tile(h_out, wp, hb, cin, cout, k, in_item, dot_item, out_item,
                   single_dot, flatten_out, budget_bytes):
    """Largest output-row tile whose real (lane/sublane-padded) working set
    fits the generation-aware VMEM budget."""
    lane_cin = max(cin, 128)              # channels live on the lane axis
    lane_cout = max(cout, 128)
    # fixed cost: single-buffered constants + double-buffered halo blocks
    fixed = (k * k * max(cin, 8) * lane_cout * dot_item     # fused weights
             + lane_cout * 4                                # bias
             + 2 * hb * wp * lane_cin * in_item)            # halo blocks
    budget = max(budget_bytes - fixed, 1 << 20)
    per_row = (2 * wp * lane_cin * in_item                  # input block (x2 buffers)
               + wp * lane_cin * (in_item + 2 * dot_item)   # concat + hoisted cast + roll tmp
               + 2 * wp * lane_cout * 4)                    # f32 acc + epilogue tmp
    if single_dot:
        per_row += wp * k * k * cin * dot_item              # im2col LHS (cin lane-aligned)
    if flatten_out:
        per_row += 2 * max(wp * cout, 128) * out_item       # lane-dense output (x2 buffers)
    else:
        per_row += 2 * wp * lane_cout * out_item
    return int(max(1, min(budget // per_row, h_out)))


def _dwconv_block_kernel(a_ref, b_ref, fw_ref, bias_ref, o_ref, *,
                         row_tile, w_out, k, dilation, halo, wp,
                         flatten_out, single_dot, dot_dtype):
    """One (batch, row-tile) grid step.

    a_ref    (1, TH, Wp, Cin)     rows of the zero-padded NHWC input
    b_ref    (1, HB, Wp, Cin)     next rows; only the first `halo` are used
    fw_ref   (K*K, Cin, Cout)     depthwise taps folded into BN-scaled pointwise
                                  weights (tap index j = kw*K + kh)
    bias_ref (1, Cout)  f32       folded BN bias
    o_ref    (1, TH, W_out*Cout)  lane-dense, or (1, TH, W_out, Cout)
    """
    rows = row_tile + halo
    x = a_ref[0]
    if halo > 0:
        # Halo rows come from the neighbouring block; concat along the untiled
        # row axis is relayout-free.
        x = jnp.concatenate([x, b_ref[0, :halo]], axis=0)        # (rows, Wp, Cin)
    cin = x.shape[-1]
    cout = fw_ref.shape[-1]
    # Hoisted, single cast to the MXU input dtype (no per-tap converts).
    x2 = x.reshape(rows * wp, cin).astype(dot_dtype)

    # K*K shifted views.  W is the sublane axis: a slice starting at kw*dil
    # would be sublane-misaligned (relayout per tap), so rotate on the XLU.
    taps = []
    for kw in range(k):
        shift = kw * dilation
        xs = x2 if shift == 0 else pltpu.roll(x2, shift=rows * wp - shift, axis=0)
        xs = xs.reshape(rows, wp, cin)                           # layout-free (wp % sub == 0)
        for kh in range(k):
            taps.append(xs[kh * dilation:kh * dilation + row_tile])   # (TH, Wp, Cin)

    # Depthwise + pointwise + BN scale as ONE MXU contraction (depthwise taps
    # are folded into fw).  The matmul is computed over the padded Wp columns;
    # garbage columns >= w_out are discarded at the store, keeping every
    # reshape around the dot layout-free.
    if single_dot:
        # Cin % 128 == 0: lane-aligned channel concat -> one dot, contraction K*K*Cin.
        lhs = jnp.concatenate(taps, axis=-1).reshape(row_tile * wp, k * k * cin)
        y = jnp.dot(lhs, fw_ref[...].reshape(k * k * cin, cout),
                    preferred_element_type=jnp.float32)
    else:
        # Small / unaligned Cin: K*K accumulated dots (no lane relayout); the
        # VPU only does K*K adds per output element instead of 2*K*K*Cin madds.
        y = jnp.zeros((row_tile * wp, cout), jnp.float32)
        for j, tap in enumerate(taps):
            y = y + jnp.dot(tap.reshape(row_tile * wp, cin), fw_ref[j],
                            preferred_element_type=jnp.float32)

    # Folded BN bias + ReLU (scale already folded into fw).
    y = jnp.maximum(y + bias_ref[...], 0.0).astype(o_ref.dtype)
    y = y.reshape(row_tile, wp, cout)[:, :w_out, :]
    if flatten_out:
        o_ref[0] = y.reshape(row_tile, w_out * cout)    # lane-dense store
    else:
        o_ref[0] = y


def depthwise_conv_block_nhwc(x_nhwc, dw_weight, pw_weight, gamma, beta,
                              running_mean, running_var, *, kernel_size=1,
                              stride=1, padding=0, dilation=1, eps=4e-5,
                              row_tile=None, mxu_bf16=False):
    """NHWC-native fused DepthwiseConvBlock forward (inference BN semantics)."""
    assert stride == 1, "only stride=1 supported"  # TODO(synk): stride > 1
    N, H, W, Cin = x_nhwc.shape
    Cout = pw_weight.shape[0]
    K = kernel_size
    halo = dilation * (K - 1)
    H_out = H + 2 * padding - halo
    W_out = W + 2 * padding - halo
    assert H_out > 0 and W_out > 0

    in_dtype = x_nhwc.dtype
    dot_dtype = jnp.bfloat16 if mxu_bf16 else jnp.float32   # bf16 is opt-in
    in_item = jnp.dtype(in_dtype).itemsize
    dot_item = jnp.dtype(dot_dtype).itemsize
    out_item = in_item

    # Sublane granule: strictest among the dtypes living on the tiled axes.
    sub = max(_sublanes(in_dtype), _sublanes(dot_dtype), 8)
    Wp = _round_up(W + 2 * padding, sub)
    hb = _round_up(max(halo, 1), sub)          # halo block rows

    single_dot = (Cin % 128 == 0)              # lane-aligned channel concat is free
    flatten_out = Cout < 128                   # lane-dense store path

    tile_budget, vmem_limit = _vmem_budget()
    if row_tile is None:
        row_tile = _auto_row_tile(H_out, Wp, hb, Cin, Cout, K, in_item,
                                  dot_item, out_item, single_dot, flatten_out,
                                  tile_budget)
    TH = max(1, min(int(row_tile), H_out))
    TH = _round_up(TH, hb)                     # multiple of hb => exact halo block index
    ratio = TH // hb
    nH = pl.cdiv(H_out, TH)
    Hp = nH * TH + hb                          # padded rows actually indexed

    # Single fused pad producer (top/left conv padding + bottom/right alignment
    # zeros).  For NCHW callers XLA fuses the NCHW->NHWC transpose into this
    # same HBM pass.
    # TODO(synk): fully in-kernel padding (clamped index_maps + row masks) would
    # remove this pass for NHWC-native, memory-bound callers.
    x_p = jnp.pad(
        x_nhwc,
        ((0, 0),
         (padding, Hp - H - padding),
         (padding, Wp - W - padding),
         (0, 0)))

    # ---- weight glue: fold BN scale AND the depthwise taps into the pointwise
    # weights (one-time, weight-sized ops) ----
    inv_std = 1.0 / jnp.sqrt(running_var.astype(jnp.float32) + eps)
    scale = gamma.astype(jnp.float32) * inv_std                              # (Cout,)
    pw_s = (jnp.transpose(pw_weight[:, :, 0, 0], (1, 0)).astype(jnp.float32)
            * scale[None, :])                                                # (Cin, Cout)
    # Tap ordering j = kw*K + kh matches the kernel's (kw outer, kh inner) loop.
    dw_t = jnp.transpose(dw_weight[:, 0, :, :], (2, 1, 0)).astype(jnp.float32)  # (Kw, Kh, Cin)
    fw = (dw_t.reshape(K * K, Cin)[:, :, None] * pw_s[None, :, :]).astype(dot_dtype)
    bias = (beta.astype(jnp.float32)
            - running_mean.astype(jnp.float32) * scale).reshape(1, Cout)

    if flatten_out:
        out_shape = jax.ShapeDtypeStruct((N, H_out, W_out * Cout), in_dtype)
        out_spec = pl.BlockSpec((1, TH, W_out * Cout), lambda n, t: (n, t, 0))
    else:
        out_shape = jax.ShapeDtypeStruct((N, H_out, W_out, Cout), in_dtype)
        out_spec = pl.BlockSpec((1, TH, W_out, Cout), lambda n, t: (n, t, 0, 0))

    kern = functools.partial(
        _dwconv_block_kernel, row_tile=TH, w_out=W_out, k=K, dilation=dilation,
        halo=halo, wp=Wp, flatten_out=flatten_out, single_dot=single_dot,
        dot_dtype=dot_dtype)

    const = pl.Buffered(1)   # weights/bias never change across the grid

    cost = pl.CostEstimate(
        flops=int(2 * N * H_out * W_out * (K * K * Cin + Cin * Cout)),
        transcendentals=0,
        bytes_accessed=int(x_p.size * in_item
                           + N * H_out * W_out * Cout * out_item
                           + fw.size * dot_item + bias.size * 4))

    out = pl.pallas_call(
        kern,
        out_shape=out_shape,
        grid_spec=pltpu.PrefetchScalarGridSpec(
            num_scalar_prefetch=0,
            grid=(N, nH),
            in_specs=[
                # main row block of this tile
                pl.BlockSpec((1, TH, Wp, Cin), lambda n, t: (n, t, 0, 0)),
                # halo rows = leading rows of the next hb-sized block
                pl.BlockSpec((1, hb, Wp, Cin),
                             lambda n, t: (n, (t + 1) * ratio, 0, 0)),
                pl.BlockSpec((K * K, Cin, Cout), lambda n, t: (0, 0, 0),
                             pipeline_mode=const),
                pl.BlockSpec((1, Cout), lambda n, t: (0, 0),
                             pipeline_mode=const),
            ],
            out_specs=out_spec,
        ),
        compiler_params=pltpu.CompilerParams(
            dimension_semantics=("parallel", "parallel"),
            vmem_limit_bytes=vmem_limit,
        ),
        cost_estimate=cost,
    )(x_p, x_p, fw, bias)

    if flatten_out:
        out = out.reshape(N, H_out, W_out, Cout)
    return out


def depthwise_conv_block(x_nchw, dw_weight, pw_weight, gamma, beta,
                         running_mean, running_var, **kw):
    """NCHW interface matching the PyTorch module.

    NHWC-resident models should call depthwise_conv_block_nhwc directly and
    skip both interface transposes; under jit XLA fuses the input transpose
    with the pad producer.
    """
    x_nhwc = jnp.transpose(x_nchw, (0, 2, 3, 1))
    y = depthwise_conv_block_nhwc(x_nhwc, dw_weight, pw_weight, gamma, beta,
                                  running_mean, running_var, **kw)
    return jnp.transpose(y, (0, 3, 1, 2))


def _reference(x, dw_weight, pw_weight, gamma, beta, rmean, rvar,
               kernel_size, padding, dilation, eps=4e-5):
    """Plain-JAX reference (matches PyTorch eval-mode forward, f32)."""
    Cin = x.shape[1]
    dn = lax.conv_dimension_numbers(x.shape, dw_weight.shape,
                                    ('NCHW', 'OIHW', 'NCHW'))
    y = lax.conv_general_dilated(
        x, dw_weight, window_strides=(1, 1),
        padding=((padding, padding), (padding, padding)),
        rhs_dilation=(dilation, dilation),
        dimension_numbers=dn, feature_group_count=Cin,
        precision=lax.Precision.HIGHEST)
    dn2 = lax.conv_dimension_numbers(y.shape, pw_weight.shape,
                                     ('NCHW', 'OIHW', 'NCHW'))
    y = lax.conv_general_dilated(y, pw_weight, (1, 1), 'VALID',
                                 dimension_numbers=dn2,
                                 precision=lax.Precision.HIGHEST)
    s = gamma / jnp.sqrt(rvar + eps)
    y = y * s[None, :, None, None] + (beta - rmean * s)[None, :, None, None]
    return jnp.maximum(y, 0.0)


if __name__ == "__main__":
    key = jax.random.PRNGKey(0)

    # ---- config 1: small-channel layer (per-tap MXU path, lane-dense store) ----
    N, Cin, H, W = 2, 4, 16, 16
    Cout, K, P, DIL = 8, 3, 1, 1

    ks = jax.random.split(key, 7)
    x = jax.random.normal(ks[0], (N, Cin, H, W), jnp.float32)
    dw_weight = jax.random.normal(ks[1], (Cin, 1, K, K), jnp.float32) * 0.2
    pw_weight = jax.random.normal(ks[2], (Cout, Cin, 1, 1), jnp.float32) * 0.2
    gamma = 1.0 + 0.1 * jax.random.normal(ks[3], (Cout,), jnp.float32)
    beta = 0.1 * jax.random.normal(ks[4], (Cout,), jnp.float32)
    rmean = 0.1 * jax.random.normal(ks[5], (Cout,), jnp.float32)
    rvar = jax.random.uniform(ks[6], (Cout,), jnp.float32, minval=0.5, maxval=1.5)

    ref = _reference(x, dw_weight, pw_weight, gamma, beta, rmean, rvar, K, P, DIL)

    # f32 MXU inputs by default (bf16 opt-in); tolerance covers the reference
    # conv's and the MXU's multi-pass f32 behaviour.
    tol = 2e-2

    # 1) explicit row_tile=8 -> grid=(N, 2): exercises the halo-block path.
    f_tiled = jax.jit(functools.partial(
        depthwise_conv_block, kernel_size=K, stride=1, padding=P, dilation=DIL,
        row_tile=8))
    out = jax.block_until_ready(
        f_tiled(x, dw_weight, pw_weight, gamma, beta, rmean, rvar))
    assert out.shape == ref.shape, (out.shape, ref.shape)
    assert jnp.allclose(out, ref, atol=tol, rtol=tol), \
        float(jnp.max(jnp.abs(out - ref)))

    # 2) default (auto, generation-aware) row tile.
    f_auto = jax.jit(functools.partial(
        depthwise_conv_block, kernel_size=K, stride=1, padding=P, dilation=DIL))
    out2 = jax.block_until_ready(
        f_auto(x, dw_weight, pw_weight, gamma, beta, rmean, rvar))
    assert jnp.allclose(out2, ref, atol=tol, rtol=tol), \
        float(jnp.max(jnp.abs(out2 - ref)))

    # ---- config 2: 128-channel layer -> single-dot im2col path (lane-aligned
    # channel concat, contraction K*K*Cin) and the non-flattened store ----
    N2, C2, H2, W2 = 1, 128, 16, 16
    ks2 = jax.random.split(jax.random.PRNGKey(1), 7)
    x2 = jax.random.normal(ks2[0], (N2, C2, H2, W2), jnp.float32)
    dw2 = jax.random.normal(ks2[1], (C2, 1, K, K), jnp.float32) * 0.2
    pw2 = jax.random.normal(ks2[2], (C2, C2, 1, 1), jnp.float32) * 0.1
    g2 = 1.0 + 0.1 * jax.random.normal(ks2[3], (C2,), jnp.float32)
    b2 = 0.1 * jax.random.normal(ks2[4], (C2,), jnp.float32)
    rm2 = 0.1 * jax.random.normal(ks2[5], (C2,), jnp.float32)
    rv2 = jax.random.uniform(ks2[6], (C2,), jnp.float32, minval=0.5, maxval=1.5)

    ref2 = _reference(x2, dw2, pw2, g2, b2, rm2, rv2, K, P, DIL)
    out3 = jax.block_until_ready(f_auto(x2, dw2, pw2, g2, b2, rm2, rv2))
    assert out3.shape == ref2.shape, (out3.shape, ref2.shape)
    assert jnp.allclose(out3, ref2, atol=3e-2, rtol=3e-2), \
        float(jnp.max(jnp.abs(out3 - ref2)))

    print("KERNEL_OK")
</pallas_src>

<mosaic_0001>
module attributes {stable_mosaic.version = 11 : i64} {
  func.func @_dwconv_block_kernel(%arg0: i32, %arg1: i32, %arg2: memref<1x8x24x4xf32, #tpu.memory_space<vmem>>, %arg3: memref<1x8x24x4xf32, #tpu.memory_space<vmem>>, %arg4: memref<9x4x8xf32, #tpu.memory_space<vmem>>, %arg5: memref<1x8xf32, #tpu.memory_space<vmem>>, %arg6: memref<1x8x128xf32, #tpu.memory_space<vmem>>) attributes {dimension_semantics = [#tpu.dimension_semantics<parallel>, #tpu.dimension_semantics<parallel>], iteration_bounds = array<i64: 2, 2>, scalar_prefetch = 0 : i64, scratch_operands = 0 : i64, tpu.core_type = #tpu.core_type<tc>, window_params = [{transform_indices = @transform_0, window_bounds = array<i64: 1, 8, 24, 4>}, {transform_indices = @transform_1, window_bounds = array<i64: 1, 8, 24, 4>}, {pipeline_mode = #tpu.pipeline_mode<synchronous>, transform_indices = @transform_2, window_bounds = array<i64: 9, 4, 8>}, {pipeline_mode = #tpu.pipeline_mode<synchronous>, transform_indices = @transform_3, window_bounds = array<i64: 1, 8>}, {transform_indices = @transform_4, window_bounds = array<i64: 1, 8, 128>}]} {
    %c0 = arith.constant 0 : index
    %c0_0 = arith.constant 0 : index
    %c0_1 = arith.constant 0 : index
    %c0_2 = arith.constant 0 : index
    %0 = vector.load %arg2[%c0, %c0_0, %c0_1, %c0_2] : memref<1x8x24x4xf32, #tpu.memory_space<vmem>>, vector<1x8x24x4xf32>
    %1 = vector.shape_cast %0 : vector<1x8x24x4xf32> to vector<8x24x4xf32>
    %c0_3 = arith.constant 0 : index
    %c0_4 = arith.constant 0 : index
    %c0_5 = arith.constant 0 : index
    %c0_6 = arith.constant 0 : index
    %2 = vector.load %arg3[%c0_3, %c0_4, %c0_5, %c0_6] : memref<1x8x24x4xf32, #tpu.memory_space<vmem>>, vector<1x2x24x4xf32>
    %3 = vector.shape_cast %2 : vector<1x2x24x4xf32> to vector<2x24x4xf32>
    %4 = tpu.concatenate %1, %3 in 0 : vector<8x24x4xf32>, vector<2x24x4xf32> -> vector<10x24x4xf32>
    %5 = vector.shape_cast %4 : vector<10x24x4xf32> to vector<240x4xf32>
    %6 = vector.shape_cast %5 : vector<240x4xf32> to vector<10x24x4xf32>
    %7 = vector.extract_strided_slice %6 {offsets = [0, 0, 0], sizes = [8, 24, 4], strides = [1, 1, 1]} : vector<10x24x4xf32> to vector<8x24x4xf32>
    %8 = vector.extract_strided_slice %6 {offsets = [1, 0, 0], sizes = [8, 24, 4], strides = [1, 1, 1]} : vector<10x24x4xf32> to vector<8x24x4xf32>
    %9 = vector.extract_strided_slice %6 {offsets = [2, 0, 0], sizes = [8, 24, 4], strides = [1, 1, 1]} : vector<10x24x4xf32> to vector<8x24x4xf32>
    %c239_i32 = arith.constant 239 : i32
    %10 = tpu.dynamic_rotate %5 by %c239_i32 dim 0 : vector<240x4xf32>, i32 -> vector<240x4xf32>
    %11 = vector.shape_cast %10 : vector<240x4xf32> to vector<10x24x4xf32>
    %12 = vector.extract_strided_slice %11 {offsets = [0, 0, 0], sizes = [8, 24, 4], strides = [1, 1, 1]} : vector<10x24x4xf32> to vector<8x24x4xf32>
    %13 = vector.extract_strided_slice %11 {offsets = [1, 0, 0], sizes = [8, 24, 4], strides = [1, 1, 1]} : vector<10x24x4xf32> to vector<8x24x4xf32>
    %14 = vector.extract_strided_slice %11 {offsets = [2, 0, 0], sizes = [8, 24, 4], strides = [1, 1, 1]} : vector<10x24x4xf32> to vector<8x24x4xf32>
    %c238_i32 = arith.constant 238 : i32
    %15 = tpu.dynamic_rotate %5 by %c238_i32 dim 0 : vector<240x4xf32>, i32 -> vector<240x4xf32>
    %16 = vector.shape_cast %15 : vector<240x4xf32> to vector<10x24x4xf32>
    %17 = vector.extract_strided_slice %16 {offsets = [0, 0, 0], sizes = [8, 24, 4], strides = [1, 1, 1]} : vector<10x24x4xf32> to vector<8x24x4xf32>
    %18 = vector.extract_strided_slice %16 {offsets = [1, 0, 0], sizes = [8, 24, 4], strides = [1, 1, 1]} : vector<10x24x4xf32> to vector<8x24x4xf32>
    %19 = vector.extract_strided_slice %16 {offsets = [2, 0, 0], sizes = [8, 24, 4], strides = [1, 1, 1]} : vector<10x24x4xf32> to vector<8x24x4xf32>
    %cst = arith.constant 0.000000e+00 : f32
    %20 = vector.broadcast %cst : f32 to vector<192x8xf32>
    %21 = vector.shape_cast %7 : vector<8x24x4xf32> to vector<192x4xf32>
    %c0_7 = arith.constant 0 : index
    %c0_8 = arith.constant 0 : index
    %c0_9 = arith.constant 0 : index
    %22 = vector.load %arg4[%c0_7, %c0_8, %c0_9] : memref<9x4x8xf32, #tpu.memory_space<vmem>>, vector<1x4x8xf32>
    %23 = vector.shape_cast %22 : vector<1x4x8xf32> to vector<4x8xf32>
    %cst_10 = arith.constant dense<0.000000e+00> : vector<192x8xf32>
    %24 = tpu.matmul %21, %23, %cst_10 {dimension_numbers = #tpu.dot_dimension_numbers<[1], [0], [0], [1], [0, 0, 1, 1], [], []>} : vector<192x4xf32>, vector<4x8xf32>, vector<192x8xf32> -> vector<192x8xf32>
    %25 = arith.addf %20, %24 : vector<192x8xf32>
    %26 = vector.shape_cast %8 : vector<8x24x4xf32> to vector<192x4xf32>
    %c1 = arith.constant 1 : index
    %c0_11 = arith.constant 0 : index
    %c0_12 = arith.constant 0 : index
    %27 = vector.load %arg4[%c1, %c0_11, %c0_12] : memref<9x4x8xf32, #tpu.memory_space<vmem>>, vector<1x4x8xf32>
    %28 = vector.shape_cast %27 : vector<1x4x8xf32> to vector<4x8xf32>
    %cst_13 = arith.constant dense<0.000000e+00> : vector<192x8xf32>
    %29 = tpu.matmul %26, %28, %cst_13 {dimension_numbers = #tpu.dot_dimension_numbers<[1], [0], [0], [1], [0, 0, 1, 1], [], []>} : vector<192x4xf32>, vector<4x8xf32>, vector<192x8xf32> -> vector<192x8xf32>
    %30 = arith.addf %25, %29 : vector<192x8xf32>
    %31 = vector.shape_cast %9 : vector<8x24x4xf32> to vector<192x4xf32>
    %c2 = arith.constant 2 : index
    %c0_14 = arith.constant 0 : index
    %c0_15 = arith.constant 0 : index
    %32 = vector.load %arg4[%c2, %c0_14, %c0_15] : memref<9x4x8xf32, #tpu.memory_space<vmem>>, vector<1x4x8xf32>
    %33 = vector.shape_cast %32 : vector<1x4x8xf32> to vector<4x8xf32>
    %cst_16 = arith.constant dense<0.000000e+00> : vector<192x8xf32>
    %34 = tpu.matmul %31, %33, %cst_16 {dimension_numbers = #tpu.dot_dimension_numbers<[1], [0], [0], [1], [0, 0, 1, 1], [], []>} : vector<192x4xf32>, vector<4x8xf32>, vector<192x8xf32> -> vector<192x8xf32>
    %35 = arith.addf %30, %34 : vector<192x8xf32>
    %36 = vector.shape_cast %12 : vector<8x24x4xf32> to vector<192x4xf32>
    %c3 = arith.constant 3 : index
    %c0_17 = arith.constant 0 : index
    %c0_18 = arith.constant 0 : index
    %37 = vector.load %arg4[%c3, %c0_17, %c0_18] : memref<9x4x8xf32, #tpu.memory_space<vmem>>, vector<1x4x8xf32>
    %38 = vector.shape_cast %37 : vector<1x4x8xf32> to vector<4x8xf32>
    %cst_19 = arith.constant dense<0.000000e+00> : vector<192x8xf32>
    %39 = tpu.matmul %36, %38, %cst_19 {dimension_numbers = #tpu.dot_dimension_numbers<[1], [0], [0], [1], [0, 0, 1, 1], [], []>} : vector<192x4xf32>, vector<4x8xf32>, vector<192x8xf32> -> vector<192x8xf32>
    %40 = arith.addf %35, %39 : vector<192x8xf32>
    %41 = vector.shape_cast %13 : vector<8x24x4xf32> to vector<192x4xf32>
    %c4 = arith.constant 4 : index
    %c0_20 = arith.constant 0 : index
    %c0_21 = arith.constant 0 : index
    %42 = vector.load %arg4[%c4, %c0_20, %c0_21] : memref<9x4x8xf32, #tpu.memory_space<vmem>>, vector<1x4x8xf32>
    %43 = vector.shape_cast %42 : vector<1x4x8xf32> to vector<4x8xf32>
    %cst_22 = arith.constant dense<0.000000e+00> : vector<192x8xf32>
    %44 = tpu.matmul %41, %43, %cst_22 {dimension_numbers = #tpu.dot_dimension_numbers<[1], [0], [0], [1], [0, 0, 1, 1], [], []>} : vector<192x4xf32>, vector<4x8xf32>, vector<192x8xf32> -> vector<192x8xf32>
    %45 = arith.addf %40, %44 : vector<192x8xf32>
    %46 = vector.shape_cast %14 : vector<8x24x4xf32> to vector<192x4xf32>
    %c5 = arith.constant 5 : index
    %c0_23 = arith.constant 0 : index
    %c0_24 = arith.constant 0 : index
    %47 = vector.load %arg4[%c5, %c0_23, %c0_24] : memref<9x4x8xf32, #tpu.memory_space<vmem>>, vector<1x4x8xf32>
    %48 = vector.shape_cast %47 : vector<1x4x8xf32> to vector<4x8xf32>
    %cst_25 = arith.constant dense<0.000000e+00> : vector<192x8xf32>
    %49 = tpu.matmul %46, %48, %cst_25 {dimension_numbers = #tpu.dot_dimension_numbers<[1], [0], [0], [1], [0, 0, 1, 1], [], []>} : vector<192x4xf32>, vector<4x8xf32>, vector<192x8xf32> -> vector<192x8xf32>
    %50 = arith.addf %45, %49 : vector<192x8xf32>
    %51 = vector.shape_cast %17 : vector<8x24x4xf32> to vector<192x4xf32>
    %c6 = arith.constant 6 : index
    %c0_26 = arith.constant 0 : index
    %c0_27 = arith.constant 0 : index
    %52 = vector.load %arg4[%c6, %c0_26, %c0_27] : memref<9x4x8xf32, #tpu.memory_space<vmem>>, vector<1x4x8xf32>
    %53 = vector.shape_cast %52 : vector<1x4x8xf32> to vector<4x8xf32>
    %cst_28 = arith.constant dense<0.000000e+00> : vector<192x8xf32>
    %54 = tpu.matmul %51, %53, %cst_28 {dimension_numbers = #tpu.dot_dimension_numbers<[1], [0], [0], [1], [0, 0, 1, 1], [], []>} : vector<192x4xf32>, vector<4x8xf32>, vector<192x8xf32> -> vector<192x8xf32>
    %55 = arith.addf %50, %54 : vector<192x8xf32>
    %56 = vector.shape_cast %18 : vector<8x24x4xf32> to vector<192x4xf32>
    %c7 = arith.constant 7 : index
    %c0_29 = arith.constant 0 : index
    %c0_30 = arith.constant 0 : index
    %57 = vector.load %arg4[%c7, %c0_29, %c0_30] : memref<9x4x8xf32, #tpu.memory_space<vmem>>, vector<1x4x8xf32>
    %58 = vector.shape_cast %57 : vector<1x4x8xf32> to vector<4x8xf32>
    %cst_31 = arith.constant dense<0.000000e+00> : vector<192x8xf32>
    %59 = tpu.matmul %56, %58, %cst_31 {dimension_numbers = #tpu.dot_dimension_numbers<[1], [0], [0], [1], [0, 0, 1, 1], [], []>} : vector<192x4xf32>, vector<4x8xf32>, vector<192x8xf32> -> vector<192x8xf32>
    %60 = arith.addf %55, %59 : vector<192x8xf32>
    %61 = vector.shape_cast %19 : vector<8x24x4xf32> to vector<192x4xf32>
    %c8 = arith.constant 8 : index
    %c0_32 = arith.constant 0 : index
    %c0_33 = arith.constant 0 : index
    %62 = vector.load %arg4[%c8, %c0_32, %c0_33] : memref<9x4x8xf32, #tpu.memory_space<vmem>>, vector<1x4x8xf32>
    %63 = vector.shape_cast %62 : vector<1x4x8xf32> to vector<4x8xf32>
    %cst_34 = arith.constant dense<0.000000e+00> : vector<192x8xf32>
    %64 = tpu.matmul %61, %63, %cst_34 {dimension_numbers = #tpu.dot_dimension_numbers<[1], [0], [0], [1], [0, 0, 1, 1], [], []>} : vector<192x4xf32>, vector<4x8xf32>, vector<192x8xf32> -> vector<192x8xf32>
    %65 = arith.addf %60, %64 : vector<192x8xf32>
    %c0_35 = arith.constant 0 : index
    %c0_36 = arith.constant 0 : index
    %66 = vector.load %arg5[%c0_35, %c0_36] : memref<1x8xf32, #tpu.memory_space<vmem>>, vector<1x8xf32>
    %67 = vector.broadcast %66 : vector<1x8xf32> to vector<192x8xf32>
    %68 = arith.addf %65, %67 : vector<192x8xf32>
    %cst_37 = arith.constant 0.000000e+00 : f32
    %69 = vector.broadcast %cst_37 : f32 to vector<192x8xf32>
    %70 = arith.maximumf %68, %69 : vector<192x8xf32>
    %71 = vector.shape_cast %70 : vector<192x8xf32> to vector<8x24x8xf32>
    %72 = vector.extract_strided_slice %71 {offsets = [0, 0, 0], sizes = [8, 16, 8], strides = [1, 1, 1]} : vector<8x24x8xf32> to vector<8x16x8xf32>
    %73 = vector.shape_cast %72 : vector<8x16x8xf32> to vector<8x128xf32>
    %c0_38 = arith.constant 0 : index
    %c0_39 = arith.constant 0 : index
    %c0_40 = arith.constant 0 : index
    %74 = vector.load %arg6[%c0_38, %c0_39, %c0_40] : memref<1x8x128xf32, #tpu.memory_space<vmem>>, vector<1x8x128xf32>
    %75 = vector.shape_cast %74 : vector<1x8x128xf32> to vector<8x128xf32>
    %76 = vector.shape_cast %73 : vector<8x128xf32> to vector<1x8x128xf32>
    tpu.vector_store %arg6[%c0_38, %c0_39, %c0_40], %76 {strides = array<i32>} : memref<1x8x128xf32, #tpu.memory_space<vmem>>, vector<1x8x128xf32>,
    return
  }
  func.func @transform_0(%arg0: i32, %arg1: i32) -> (i32, i32, i32, i32) {
    %c0_i32 = arith.constant 0 : i32
    %c0_i32_0 = arith.constant 0 : i32
    %c0_i32_1 = arith.constant 0 : i32
    return %arg0, %arg1, %c0_i32, %c0_i32_0 : i32, i32, i32, i32
  }
  func.func @transform_1(%arg0: i32, %arg1: i32) -> (i32, i32, i32, i32) {
    %c1_i32 = arith.constant 1 : i32
    %0 = arith.addi %arg1, %c1_i32 : i32
    %c1_i32_0 = arith.constant 1 : i32
    %1 = arith.muli %0, %c1_i32_0 : i32
    %c0_i32 = arith.constant 0 : i32
    %c0_i32_1 = arith.constant 0 : i32
    %c0_i32_2 = arith.constant 0 : i32
    return %arg0, %1, %c0_i32, %c0_i32_1 : i32, i32, i32, i32
  }
  func.func @transform_2(%arg0: i32, %arg1: i32) -> (i32, i32, i32) {
    %c0_i32 = arith.constant 0 : i32
    %c0_i32_0 = arith.constant 0 : i32
    %c0_i32_1 = arith.constant 0 : i32
    %c0_i32_2 = arith.constant 0 : i32
    return %c0_i32, %c0_i32_0, %c0_i32_1 : i32, i32, i32
  }
  func.func @transform_3(%arg0: i32, %arg1: i32) -> (i32, i32) {
    %c0_i32 = arith.constant 0 : i32
    %c0_i32_0 = arith.constant 0 : i32
    %c0_i32_1 = arith.constant 0 : i32
    return %c0_i32, %c0_i32_0 : i32, i32
  }
  func.func @transform_4(%arg0: i32, %arg1: i32) -> (i32, i32, i32) {
    %c0_i32 = arith.constant 0 : i32
    %c0_i32_0 = arith.constant 0 : i32
    return %arg0, %arg1, %c0_i32 : i32, i32, i32
  }
}

</mosaic_0001>

<bundles_post_ra>
// kernel: mul.19
= control target key start
LH: loop header
LB: loop body
LE: loop exit
PB: predicated region body
PF: predicated region fallthrough
CT: control target
= control target key end

     0   :  { %vm22_vm0 = vcmask 23552   ;;  %s52_s14 = smov 3   ;;  %vm28_vm1 = vcmask 72752   ;;  %vm34_vm2 = vcmask 48152   ;;  %s78_s0 = inlined_call_operand.vmem [shape: f32[3,3,4], index: 0, kind: input, shape index: {}]   ;;  %s79_s1 = inlined_call_operand.vmem [shape: f32[9,4], index: 1, kind: output, shape index: {}]  }
   0x1   :  { %v46_v0 = vld [vmem:[%s78_s0 + $0xc] sm:$0xf]  ;;  %v47_v1 = vld [vmem:[%s78_s0 + $0x8] sm:$0xf]  ;;  %v48_v2 = vld [vmem:[%s78_s0 + $0x4] sm:$0xf] }
   0x2   :  { %9 = vst [vmem:[#allocation1 + $0x18] sm:$0xf] %v46_v0  ;;  %14 = vst [vmem:[#allocation1 + $0x10] sm:$0xf] %v47_v1  ;;  %v19_v3 = vld [vmem:[%s78_s0] sm:$0xf] }
   0x3   :  { %18 = vst [vmem:[#allocation1 + $0x8] sm:$0xf] %v48_v2  ;;  %20 = vst [vmem:[#allocation1] sm:$0xf] %v19_v3  ;;  %s51_s0 = smov 6  }
   0xa   :  { %v25_v4 = vld [vmem:[#allocation1 + $0x2] ss:$8 sm:$0xf]   ;;  %v21_v5 = vld [vmem:[#allocation1] ss:$8 sm:$0xf]  }
   0xb   :  { %26 = vrot.lane.b32.xlu0 %v25_v4, %s51_s0  ;;  %v31_v6 = vld [vmem:[#allocation1 + $0x1] ss:$8 sm:$0xf]   ;;  %23 = vst.msk [vmem:[#allocation0] sm:$0xf] %vm22_vm0, %v21_v5  }
   0xf   :  { %32 = vrot.lane.b32.xlu0 %v31_v6, %s52_s14 }
  0x7d   :  { %v27_v7 = vpop.permute.xlu0 %26  }
  0x7e   :  { %29 = vst.msk [vmem:[#allocation0] sm:$0xf] %vm28_vm1, %v27_v7  }
  0x81   :  { %v33_v8 = vpop.permute.xlu0 %32  }
  0x82   :  { %35 = vst.msk [vmem:[#allocation0] sm:$0xf] %vm34_vm2, %v33_v8  }
  0x89   :  { %v40_v9 = vld [vmem:[#allocation0] sm:$0xf] }
  0x8a   :  { %43 = vst [vmem:[%s79_s1] sm:$0xf] %v40_v9 }

// kernel: depthwise_conv_block.1
= control target key start
LH: loop header
LB: loop body
LE: loop exit
PB: predicated region body
PF: predicated region fallthrough
CT: control target
= control target key end

     0   :  { %s3930_s15 = smov 0   ;;  %s3932_s16 = smov 0   ;;  %s5201_s0 = inlined_call_operand.vmem [shape: f32[2,24,24,4], index: 0, kind: input, shape index: {}, may-alias: {0,1}]   ;;  %s5202_s1 = inlined_call_operand.vmem [shape: f32[2,24,24,4], index: 1, kind: input, shape index: {}, may-alias: {0,1}]   ;;  %s5203_s2 = inlined_call_operand.vmem [shape: f32[9,4,8], index: 2, kind: input, shape index: {}]   ;;  %s5204_s3 = inlined_call_operand.vmem [shape: f32[1,8], index: 3, kind: input, shape index: {}]   ;;  %s5205_s4 = inlined_call_operand.vmem [shape: f32[2,16,128], index: 4, kind: output, shape index: {}]  }
   0x1   :  { %s3934_s17 = smov 0   ;;  %s3936_s18 = smov 0  }
   0x2   :  { %s3938_s19 = smov 0  }
   0x3 LB: > { %s23_s20 = sadd.s32 1, %s3878_s17  ;;  %s26_s21 = sadd.s32 1, %s3882_s18  ;;  %s3886_s19 = sphi %s3938_s19, %s14_s19   ;;  %s3882_s18 = sphi %s3936_s18, %s5278_s18   ;;  %s3878_s17 = sphi %s3934_s17, %s5277_s17   ;;  %s3874_s16 = sphi %s3932_s16, %s5276_s16   ;;  %s3870_s15 = sphi %s3930_s15, %s5275_s15  }
   0x4   : > { %p24_p0 = scmp.ge.s32.totalorder %s23_s20, 2  ;;  %p2974_p1 = scmp.ge.s32.totalorder %s3886_s19, 1 }
   0x5   : > { %p206_p2 = scmp.lt.s32.totalorder %s3886_s19, 5 }
   0x6   : > { %s5280_s20 = smov (%p24_p0, %s23_s20), 0  ;;  %s5282_s21 = smov (!%p24_p0, %s26_s21), %s3882_s18 }
   0x7   : > { %p207_p3 = pnand %p2974_p1, %p206_p2  ;;  %p28_p4 = scmp.ge.s32.totalorder %s5282_s21, 2 }
   0x9   : > { %s5284_s21 = smov (%p28_p4, %s5282_s21), 0  ;;  %210 = sbr.rel (%p207_p3) target bundleno = 590 (0x24e), region = 36 }
   0xe   : > { %v2981_v0 = vld [vmem:[%s5203_s2 + $0x4] sm:$0xf]  ;;  %vm513_vm0 = vcmask 1043456   ;;  %s2975_s24 = sshll.u32 %s3870_s15, 3  ;;  %p252_p5 = scmp.lt.s32.totalorder %s3874_s16, 1  ;;  %v343_v3 = vlaneseq  ;;  %vm440_vm1 = vcmask 31744  }
   0xf   : > { %3786 = vmatprep.subr.msk.mxu1 %vm513_vm0, %v2981_v0  ;;  %3444 = vmatprep.subr.msk.mxu0 %vm513_vm0, %v2981_v0  ;;  %p254_p6 = scmp.lt.s32.totalorder %s2975_s24, 23  ;;  %v437_v1 = vld [vmem:[%s5203_s2] sm:$0xf]  ;;  %v3032_v2 = vld [vmem:[%s5203_s2 + $0x8] sm:$0xf]  ;;  %s3218_s29 = sadd.s32 8, %s2975_s24 }
  0x10   : > { %3787 = vmatpush3.msk.msra.mxu1 %vm513_vm0, %v2981_v0  ;;  %3445 = vmatpush3.msk.msra.mxu0 %vm513_vm0, %v2981_v0  ;;  %s5286_s16 = smov (!%p252_p5, %s3874_s16), 1  ;;  %p266_p7 = scmp.lt.s32.totalorder %s3218_s29, 23  ;;  %v3981_v4 = vshrl.u32 %v343_v3, 7  ;;  %v4015_v12 = vld [vmem:[%s5203_s2 + $0xc] sm:$0xf]  ;;  %vm2829_vm4 = vcmask 64512  }
  0x11   : > { %s5288_s24 = smov (!%p254_p6, %s2975_s24), 23  ;;  %3482 = vmatprep.subr.msk.mxu1 %vm513_vm0, %v437_v1  ;;  %3520 = vmatprep.subr.msk.mxu0 %vm513_vm0, %v3032_v2  ;;  %s3789_s30 = smul.u32 72, %s5286_s16  ;;  %v4031_v16 = vld [vmem:[%s5203_s2 + $0x10] sm:$0xf]  ;;  %vm2831_vm5 = vcmask 130048   ;;  %vm2833_vm6 = vcmask 195584  }
  0x12   : > { %s3788_s5 = smul.u32 3, %s5288_s24  ;;  %s5290_s29 = smov (!%p266_p7, %s3218_s29), 23  ;;  %vm345_vm2 = vcmp.lt.s32.totalorder %v3981_v4, 7  ;;  %vm406_vm3 = vcmp.lt.s32.totalorder %v3981_v4, 6  ;;  %vm2835_vm7 = vcmask 261120   ;;  %vm2837_vm8 = vcmask 326656  }
  0x13   : > { %s3790_s8 = smul.u32 3, %s5290_s29  ;;  %s3891_s13 = smov 8   ;;  %vm2839_vm9 = vcmask 392192   ;;  %vm2841_vm10 = vcmask 457728   ;;  %vm2843_vm11 = vcmask 523264   ;;  %vm2845_vm12 = vcmask 588800  }
  0x14   : > { %s258_s6 = sadd.s32 %s3789_s30, %s3788_s5  ;;  %s3892_s14 = smov 32   ;;  %vm2847_vm13 = vcmask 654336   ;;  %vm2849_vm14 = vcmask 719872   ;;  %vm2851_vm15 = vcmask 785408  }
  0x15   : > { %s2976_s7 = sshll.u32 %s258_s6, 3  ;;  %s4010_s12 = sadd.s32 %s3790_s8, %s3789_s30 }
  0x16   : > { %s3986_s11 = scalar_lea.vmem %s5201_s0, %s2976_s7  ;;  %s2978_s24 = sshll.u32 %s4010_s12, 3 }
  0x17   : > { %v3989_v5 = vld [vmem:[%s3986_s11 + $0x18] sm:$0xff]  ;;  %v3995_v7 = vld [vmem:[%s3986_s11 + $0x20] sm:$0xff]  ;;  %v4008_v11 = vld [vmem:[%s3986_s11 + $0x28] sm:$0xff]  ;;  %s4118_s27 = scalar_lea.vmem %s5202_s1, %s2978_s24  ;;  %s3890_s12 = smov 24  }
  0x18   : > { %v3992_v6 = vld [vmem:[%s3986_s11 + $0x78] sm:$0xff]  ;;  %v5207_v8 = vrot.slane %v3989_v5, 1  ;;  %3446 = vmatprep.mubr.msk.f32.mxu0 %vm440_vm1, %v3989_v5  ;;  %v317_v9 = vrot.slane %v3995_v7, 1  ;;  %v4005_v10 = vld [vmem:[%s3986_s11 + $0x80] sm:$0xff]  ;;  %v318_v13 = vrot.slane %v4008_v11, 1  ;;  %v4023_v14 = vld [vmem:[%s3986_s11 + $0x88] sm:$0xff] }
  0x19   : > { %3464 = vmatprep.mubr.msk.f32.mxu1 %vm440_vm1, %v3992_v6  ;;  %3447 = vmatmul.mubr.msk.f32.vlgmr.msra.gmra.mxu0 %vm440_vm1, %v3995_v7  ;;  %v4026_v15 = vld [vmem:[%s3986_s11 + $0x30] sm:$0xff]  ;;  %v4039_v18 = vld [vmem:[%s3986_s11 + $0x38] sm:$0xff]  ;;  %v4042_v19 = vld [vmem:[%s3986_s11 + $0x40] sm:$0xff]  ;;  %v328_v22 = vrot.slane %v3992_v6, 1  ;;  %v329_v23 = vrot.slane %v4005_v10, 1  ;;  %v330_v45 = vrot.slane %v4023_v14, 1 }
  0x1a   : > { %3465 = vmatmul.mubr.msk.f32.vlgmr.msra.gmra.mxu1 %vm440_vm1, %v4005_v10  ;;  %3521 = vmatpush3.msk.msra.mxu0 %vm513_vm0, %v3032_v2  ;;  %v4036_v17 = vld [vmem:[%s3986_s11 + $0x90] sm:$0xff]  ;;  %v4048_v20 = vsel %vm345_vm2, %v5207_v8, %v317_v9  ;;  %v319_v21 = vrot.slane %v4026_v15, 1  ;;  %v4058_v24 = vld [vmem:[%s3986_s11 + $0x98] sm:$0xff]  ;;  %v4061_v25 = vld [vmem:[%s3986_s11 + $0x48] sm:$0xff]  ;;  %v4066_v26 = vsel %vm345_vm2, %v317_v9, %v318_v13  ;;  %v320_v27 = vrot.slane %v4039_v18, 1  ;;  %s3893_s22 = smov 16  }
  0x1b   : > { %3483 = vmatpush3.msk.msra.mxu1 %vm513_vm0, %v437_v1  ;;  %3449 = vmatprep.mubr.msk.f32.mxu0 %vm440_vm1, %v4008_v11  ;;  %v321_v28 = vrot.slane %v4042_v19, 1  ;;  %v4071_v29 = vld [vmem:[%s3986_s11 + $0x50] sm:$0xff]  ;;  %v4074_v30 = vld [vmem:[%s3986_s11 + $0x58] sm:$0xff]  ;;  %v322_v32 = vrot.slane %v4061_v25, 1  ;;  %v4089_v33 = vsel %vm345_vm2, %v328_v22, %v329_v23  ;;  %v4110_v38 = vld [vmem:[%s3986_s11 + $0xa0] sm:$0xff]  ;;  %v331_v46 = vrot.slane %v4036_v17, 1 }
  0x1c   : > { %3467 = vmatprep.mubr.msk.f32.mxu1 %vm440_vm1, %v4023_v14  ;;  %3558 = vmatprep.subr.msk.mxu1 %vm513_vm0, %v4015_v12  ;;  %v4082_v31 = vsel %vm345_vm2, %v318_v13, %v319_v21  ;;  %v4097_v34 = vsel %vm345_vm2, %v319_v21, %v320_v27  ;;  %v323_v36 = vrot.slane %v4071_v29, 1  ;;  %v324_v37 = vrot.slane %v4074_v30, 1  ;;  %v4113_v39 = vld [vmem:[%s3986_s11 + $0x60] sm:$0xff]  ;;  %v4125_v41 = vld [vmem:[%s3986_s11 + $0xa8] sm:$0xff]  ;;  %v4143_v47 = vld [vmem:[%s3986_s11 + $0xb0] sm:$0xff]  ;;  %s3894_s23 = smov 48  }
  0x1d   : > { %3596 = vmatprep.subr.msk.mxu0 %vm513_vm0, %v4031_v16  ;;  %3450 = vmatmul.mubr.msk.f32.gmra.mxu0 %vm440_vm1, %v4026_v15  ;;  %v4101_v35 = vsel %vm345_vm2, %v320_v27, %v321_v28  ;;  %v4122_v40 = vsel %vm345_vm2, %v321_v28, %v322_v32  ;;  %v325_v44 = vrot.slane %v4113_v39, 1  ;;  %v4146_v48 = vld [vmem:[%s4118_s27] sm:$0xff]  ;;  %v379_v49 = vrot.slane %v3989_v5, 2  ;;  %v4157_v52 = vld [vmem:[%s3986_s11 + $0x68] sm:$0xff]  ;;  %v4163_v54 = vld [vmem:[%s4118_s27 + $0x10] sm:$0xff]  ;;  %s3895_s24 = smov 40  }
  0x1e   : > { %3468 = vmatmul.mubr.msk.f32.gmra.mxu1 %vm440_vm1, %v4036_v17  ;;  %3452 = vmatprep.mubr.msk.f32.mxu0 %vm440_vm1, %v4039_v18  ;;  %v4129_v42 = vsel %vm345_vm2, %v322_v32, %v323_v36  ;;  %v4133_v43 = vsel %vm345_vm2, %v323_v36, %v324_v37  ;;  %v380_v50 = vrot.slane %v3995_v7, 2  ;;  %v337_v51 = vrot.slane %v4146_v48, 1  ;;  %v4160_v53 = vld [vmem:[%s4118_s27 + $0x8] sm:$0xff]  ;;  %v4166_v55 = vld [vmem:[%s3986_s11 + $0xb8] sm:$0xff]  ;;  %v4170_v57 = vld [vmem:[%s3986_s11 + $0x70] sm:$0xff]  ;;  %s3896_s25 = smov 56  }
  0x1f   : > { %3470 = vmatprep.mubr.msk.f32.mxu1 %vm440_vm1, %v4058_v24  ;;  %v338_v56 = vrot.slane %v4160_v53, 1  ;;  %v5206_v58 = vrot.slane %v4163_v54, 1  ;;  %v4175_v59 = vsel %vm345_vm2, %v324_v37, %v325_v44  ;;  %v326_v60 = vrot.slane %v4157_v52, 1  ;;  %v4179_v61 = vld [vmem:[%s3986_s11 + $0x10] sm:$0xff]  ;;  %v4222_v32 = vld [vmem:[%s3986_s11 + $0x8] sm:$0xff]  ;;  %s3897_s26 = smov 64  }
  0x20   : > { %v327_v62 = vrot.slane %v4170_v57, 1  ;;  %v4184_v63 = vsel %vm345_vm2, %v329_v23, %v330_v45  ;;  %v4188_v0 = vsel %vm345_vm2, %v330_v45, %v331_v46  ;;  %v332_v1 = vrot.slane %v4058_v24, 1  ;;  %s3899_s28 = smov 80   ;;  %s3900_s29 = smov 88  }
  0x21   : > { %3453 = vmatmul.mubr.msk.f32.gmra.mxu0 %vm440_vm1, %v4042_v19  ;;  %v381_v2 = vrot.slane %v4008_v11, 2  ;;  %v378_v3 = vrot.slane %v4179_v61, 2  ;;  %v4199_v9 = vsel %vm345_vm2, %v325_v44, %v326_v60  ;;  %v333_v13 = vrot.slane %v4110_v38, 1  ;;  %s3901_s30 = smov 96   ;;  %s3902_s5 = smov 104  }
  0x22   : > { %3471 = vmatmul.mubr.msk.f32.gmra.mxu1 %vm440_vm1, %v4110_v38  ;;  %3455 = vmatprep.mubr.msk.f32.mxu0 %vm440_vm1, %v4061_v25  ;;  %v4208_v21 = vsel %vm345_vm2, %v326_v60, %v327_v62  ;;  %v4214_v23 = vsel %vm345_vm2, %v327_v62, %v328_v22  ;;  %v4218_v27 = vsel %vm345_vm2, %v331_v46, %v332_v1  ;;  %v334_v28 = vrot.slane %v4125_v41, 1  ;;  %s3903_s6 = smov 112   ;;  %s3904_s7 = smov 120  }
  0x23   : > { %3473 = vmatprep.mubr.msk.f32.mxu1 %vm440_vm1, %v4125_v41  ;;  %v4226_v36 = vsel %vm345_vm2, %v332_v1, %v333_v13  ;;  %v335_v37 = vrot.slane %v4143_v47, 1  ;;  %v336_v44 = vrot.slane %v4166_v55, 1  ;;  %v4232_v22 = vsel %vm345_vm2, %v337_v51, %v338_v56  ;;  %p277_p8 = scmp.lt.s32.totalorder %s3870_s15, 1  ;;  %s2979_s8 = sshll.u32 %s5286_s16, 1 }
  0x24   : > { %5228 = vst [vmem:[#allocation2_spill] sm:$0xff] %v4232_v22  ;;  %v4236_v45 = vsel %vm345_vm2, %v333_v13, %v334_v28  ;;  %v4242_v46 = vsel %vm345_vm2, %v338_v56, %v5206_v58  ;;  %v5208_v60 = vrot.slane %v4222_v32, 2  ;;  %v382_v13 = vrot.slane %v4026_v15, 2 }
  0x25   : > { %3456 = vmatmul.mubr.msk.f32.gmra.mxu0 %vm440_vm1, %v4071_v29  ;;  %5229 = vst [vmem:[#allocation3_spill] sm:$0xff] %v4242_v46  ;;  %v4251_v62 = vsel %vm345_vm2, %v334_v28, %v335_v37  ;;  %v4255_v1 = vsel %vm345_vm2, %v335_v37, %v336_v44  ;;  %v4259_v56 = vsel %vm345_vm2, %v336_v44, %v337_v51  ;;  %v383_v51 = vrot.slane %v4039_v18, 2  ;;  %v4278_v44 = vld [vmem:[%s3986_s11] sm:$0xff]  ;;  %s5292_s15 = smov (!%p277_p8, %s3870_s15), 1 }
  0x26   : > { %3474 = vmatmul.mubr.msk.f32.gmra.mxu1 %vm440_vm1, %v4143_v47  ;;  %3458 = vmatprep.mubr.msk.f32.mxu0 %vm440_vm1, %v4074_v30  ;;  %v4270_v28 = vsel %vm406_vm3, %v5208_v60, %v378_v3  ;;  %v4274_v37 = vsel %vm406_vm3, %v378_v3, %v379_v49  ;;  %v4282_v58 = vsel %vm406_vm3, %v379_v49, %v380_v50  ;;  %v386_v46 = vrot.slane %v4071_v29, 2  ;;  %s280_s9 = sadd.s32 %s2979_s8, %s5292_s15 }
  0x27   : > { %3476 = vmatprep.mubr.msk.f32.mxu1 %vm440_vm1, %v4166_v55  ;;  %5230 = vst [vmem:[#allocation4_spill] sm:$0xff] %v4270_v28  ;;  %5231 = vst [vmem:[#allocation5_spill] sm:$0xff] %v4274_v37  ;;  %v4286_v8 = vsel %vm406_vm3, %v380_v50, %v381_v2  ;;  %v4290_v60 = vsel %vm406_vm3, %v381_v2, %v382_v13  ;;  %v384_v28 = vrot.slane %v4042_v19, 2  ;;  %v385_v37 = vrot.slane %v4061_v25, 2  ;;  %s2980_s10 = sshll.u32 %s280_s9, 3 }
  0x28   : > { %5232 = vst [vmem:[#allocation6_spill] sm:$0xff] %v4282_v58  ;;  %5233 = vst [vmem:[#allocation7_spill] sm:$0xff] %v4286_v8  ;;  %v4295_v3 = vsel %vm406_vm3, %v382_v13, %v383_v51  ;;  %v387_v49 = vrot.slane %v4074_v30, 2  ;;  %v388_v2 = vrot.slane %v4113_v39, 2  ;;  %v389_v13 = vrot.slane %v4157_v52, 2 }
  0x29   : > { %3459 = vmatmul.mubr.msk.f32.gmra.mxu0 %vm440_vm1, %v4113_v39  ;;  %5234 = vst [vmem:[#allocation8_spill] sm:$0xff] %v4290_v60  ;;  %5235 = vst [vmem:[#allocation9_spill] sm:$0xff] %v4295_v3  ;;  %v4306_v50 = vsel %vm406_vm3, %v383_v51, %v384_v28  ;;  %v390_v3 = vrot.slane %v4170_v57, 2  ;;  %v4317_v60 = vsel %vm406_vm3, %v384_v28, %v385_v37  ;;  %v391_v8 = vrot.slane %v3992_v6, 2 }
  0x2a   : > { %3477 = vmatmul.mubr.msk.f32.gmra.mxu1 %vm440_vm1, %v4146_v48  ;;  %3461 = vmatprep.mubr.msk.f32.mxu0 %vm440_vm1, %v4157_v52  ;;  %5236 = vst [vmem:[#allocation10_spill] sm:$0xff] %v4306_v50  ;;  %5237 = vst [vmem:[#allocation11_spill] sm:$0xff] %v4317_v60  ;;  %v4321_v51 = vsel %vm406_vm3, %v385_v37, %v386_v46  ;;  %v4325_v50 = vsel %vm406_vm3, %v386_v46, %v387_v49  ;;  %v392_v37 = vrot.slane %v4005_v10, 2 }
  0x2b   : > { %3479 = vmatprep.mubr.msk.f32.mxu1 %vm440_vm1, %v4160_v53  ;;  %5238 = vst [vmem:[#allocation12_spill] sm:$0xff] %v4321_v51  ;;  %5239 = vst [vmem:[#allocation13_spill] sm:$0xff] %v4325_v50  ;;  %v4330_v58 = vsel %vm406_vm3, %v387_v49, %v388_v2  ;;  %v4334_v22 = vsel %vm406_vm3, %v388_v2, %v389_v13  ;;  %v4338_v28 = vsel %vm406_vm3, %v389_v13, %v390_v3  ;;  %v4352_v49 = vld [vmem:[%s4118_s27 + $0x20] sm:$0xff]  ;;  %v4357_v2 = vld [vmem:[%s5203_s2 + $0x14] sm:$0xf] }
  0x2c   : > { %5240 = vst [vmem:[#allocation14_spill] sm:$0xff] %v4330_v58  ;;  %5241 = vst [vmem:[#allocation15_spill] sm:$0xff] %v4334_v22  ;;  %v4343_v46 = vsel %vm406_vm3, %v390_v3, %v391_v8  ;;  %v393_v50 = vrot.slane %v4023_v14, 2  ;;  %v394_v51 = vrot.slane %v4036_v17, 2  ;;  %v4362_v3 = vld [vmem:[%s5203_s2 + $0x18] sm:$0xf]  ;;  %v4366_v13 = vsel %vm406_vm3, %v391_v8, %v392_v37 }
  0x2d   : > { %3462 = vmatmul.mubr.msk.f32.gmra.mxu0 %vm440_vm1, %v4170_v57  ;;  %5242 = vst [vmem:[#allocation16_spill] sm:$0xff] %v4338_v28  ;;  %5243 = vst [vmem:[#allocation17_spill] sm:$0xff] %v4343_v46  ;;  %v395_v46 = vrot.slane %v4058_v24, 2  ;;  %v341_v28 = vrot.slane %v4352_v49, 1  ;;  %v396_v8 = vrot.slane %v4110_v38, 2  ;;  %v313_v60 = vrot.slane %v4278_v44, 1 }
  0x2e   : > { %3480 = vmatmul.mubr.msk.f32.gmra.mxu1 %vm440_vm1, %v4163_v54  ;;  %3522 = vmatprep.mubr.msk.f32.mxu0 %vm440_vm1, %v4026_v15  ;;  %5244 = vst [vmem:[#allocation18_spill] sm:$0xff] %v4366_v13  ;;  %v4376_v22 = vsel %vm406_vm3, %v392_v37, %v393_v50  ;;  %v4380_v58 = vsel %vm406_vm3, %v393_v50, %v394_v51  ;;  %v397_v37 = vrot.slane %v4125_v41, 2  ;;  %v400_v13 = vrot.slane %v4146_v48, 2 }
  0x2f   : > { %3484 = vmatprep.mubr.msk.f32.mxu1 %vm440_vm1, %v4278_v44  ;;  %5245 = vst [vmem:[#allocation19_spill] sm:$0xff] %v4376_v22  ;;  %5246 = vst [vmem:[#allocation20_spill] sm:$0xff] %v4380_v58  ;;  %v4396_v22 = vld [vmem:[%s4118_s27 + $0x28] sm:$0xff]  ;;  %v4404_v50 = vsel %vm406_vm3, %v395_v46, %v396_v8 }
  0x30   : > { %5248 = vst [vmem:[#allocation22_spill] sm:$0xff] %v4404_v50  ;;  %v398_v50 = vrot.slane %v4143_v47, 2  ;;  %v4425_v58 = vsel %vm406_vm3, %v396_v8, %v397_v37  ;;  %v399_v8 = vrot.slane %v4166_v55, 2 }
  0x31   : > { %3523 = vmatmul.mubr.msk.f32.vlgmr.msra.gmra.mxu0 %vm440_vm1, %v4039_v18 }
  0x32   : > { %3485 = vmatmul.mubr.msk.f32.vlgmr.msra.gmra.mxu1 %vm440_vm1, %v4222_v32  ;;  %3597 = vmatpush3.msk.msra.mxu0 %vm513_vm0, %v4031_v16  ;;  %v4392_v16 = vsel %vm406_vm3, %v394_v51, %v395_v46  ;;  %v342_v51 = vrot.slane %v4396_v22, 1 }
  0x33   : > { %3559 = vmatpush3.msk.msra.mxu1 %vm513_vm0, %v4015_v12  ;;  %3487 = vmatprep.mubr.msk.f32.mxu1 %vm440_vm1, %v4179_v61  ;;  %v4388_v12 = vld [vmem:[%s4118_s27 + $0x18] sm:$0xff]  ;;  %5247 = vst [vmem:[#allocation21_spill] sm:$0xff] %v4392_v16  ;;  %s3898_s27 = smov 72  }
  0x34   : > { %3525 = vmatprep.mubr.msk.f32.mxu0 %vm440_vm1, %v4042_v19  ;;  %3634 = vmatprep.subr.msk.mxu1 %vm513_vm0, %v4357_v2  ;;  %v5249_v16 = vrot.slane %v4388_v12, 1 }
  0x35   : > { %3672 = vmatprep.subr.msk.mxu0 %vm513_vm0, %v4362_v3  ;;  %3526 = vmatmul.mubr.msk.f32.gmra.mxu0 %vm440_vm1, %v4061_v25 }
  0x36   : > { %3488 = vmatmul.mubr.msk.f32.gmra.mxu1 %vm440_vm1, %v3989_v5  ;;  %3528 = vmatprep.mubr.msk.f32.mxu0 %vm440_vm1, %v4071_v29  ;;  %v4420_v46 = vsel %vm345_vm2, %v5249_v16, %v341_v28  ;;  %v4439_v16 = vsel %vm345_vm2, %v341_v28, %v342_v51  ;;  %v4458_v28 = vsel %vm406_vm3, %v399_v8, %v400_v13 }
  0x37   : > { %3490 = vmatprep.mubr.msk.f32.mxu1 %vm440_vm1, %v3995_v7  ;;  %v4431_v7 = vsel %vm406_vm3, %v397_v37, %v398_v50  ;;  %v4448_v37 = vsel %vm345_vm2, %v342_v51, %v313_v60 }
  0x39   : > { %3529 = vmatmul.mubr.msk.f32.gmra.mxu0 %vm440_vm1, %v4074_v30 }
  0x3a   : > { %3491 = vmatmul.mubr.msk.f32.gmra.mxu1 %vm440_vm1, %v4008_v11  ;;  %3531 = vmatprep.mubr.msk.f32.mxu0 %vm440_vm1, %v4113_v39  ;;  %v4452_v11 = vsel %vm406_vm3, %v398_v50, %v399_v8 }
  0x3b   : > { %3493 = vmatprep.mubr.msk.f32.mxu1 %vm440_vm1, %v4026_v15 }
  0x3d   : > { %3532 = vmatmul.mubr.msk.f32.gmra.mxu0 %vm440_vm1, %v4157_v52 }
  0x3e   : > { %3494 = vmatmul.mubr.msk.f32.gmra.mxu1 %vm440_vm1, %v4039_v18  ;;  %3534 = vmatprep.mubr.msk.f32.mxu0 %vm440_vm1, %v4170_v57  ;;  %v402_v18 = vrot.slane %v4163_v54, 2 }
  0x3f   : > { %3496 = vmatprep.mubr.msk.f32.mxu1 %vm440_vm1, %v4042_v19  ;;  %v5250_v19 = vrot.slane %v3989_v5, 1  ;;  %v403_v5 = vrot.slane %v4388_v12, 2 }
  0x41   : > { %3535 = vmatmul.mubr.msk.f32.gmra.mxu0 %vm440_vm1, %v3992_v6 }
  0x42   : > { %3497 = vmatmul.mubr.msk.f32.gmra.mxu1 %vm440_vm1, %v4061_v25  ;;  %3537 = vmatprep.mubr.msk.f32.mxu0 %vm440_vm1, %v4005_v10  ;;  %v4549_v25 = vld [vmem:[%s5203_s2 + $0x1c] sm:$0xf] }
  0x43   : > { %3499 = vmatprep.mubr.msk.f32.mxu1 %vm440_vm1, %v4071_v29  ;;  %v4554_v29 = vld [vmem:[%s5203_s2 + $0x20] sm:$0xf] }
  0x45   : > { %3538 = vmatmul.mubr.msk.f32.gmra.mxu0 %vm440_vm1, %v4023_v14 }
  0x46   : > { %3500 = vmatmul.mubr.msk.f32.gmra.mxu1 %vm440_vm1, %v4074_v30  ;;  %3540 = vmatprep.mubr.msk.f32.mxu0 %vm440_vm1, %v4036_v17 }
  0x47   : > { %3502 = vmatprep.mubr.msk.f32.mxu1 %vm440_vm1, %v4113_v39 }
  0x49   : > { %3541 = vmatmul.mubr.msk.f32.gmra.mxu0 %vm440_vm1, %v4058_v24 }
  0x4a   : > { %3503 = vmatmul.mubr.msk.f32.gmra.mxu1 %vm440_vm1, %v4157_v52  ;;  %3543 = vmatprep.mubr.msk.f32.mxu0 %vm440_vm1, %v4110_v38  ;;  %v5252_v52 = vld [vmem:[#allocation3_spill] sm:$0xff] }
  0x4b   : > { %3505 = vmatprep.mubr.msk.f32.mxu1 %vm440_vm1, %v4170_v57 }
  0x4d   : > { %3544 = vmatmul.mubr.msk.f32.gmra.mxu0 %vm440_vm1, %v4125_v41 }
  0x4e   : > { %3506 = vmatmul.mubr.msk.f32.gmra.mxu1 %vm440_vm1, %v3992_v6  ;;  %3546 = vmatprep.mubr.msk.f32.mxu0 %vm440_vm1, %v4143_v47  ;;  %v314_v6 = vrot.slane %v4222_v32, 1 }
  0x4f   : > { %3508 = vmatprep.mubr.msk.f32.mxu1 %vm440_vm1, %v4005_v10  ;;  %v315_v10 = vrot.slane %v4179_v61, 1  ;;  %v5255_v61 = vrot.slane %v4222_v32, 2  ;;  %v5257_v32 = vld [vmem:[#allocation5_spill] sm:$0xff] }
  0x51   : > { %3547 = vmatmul.mubr.msk.f32.gmra.mxu0 %vm440_vm1, %v4166_v55  ;;  %v373_v15 = vsel %vm345_vm2, %v314_v6, %v315_v10 }
  0x52   : > { %3509 = vmatmul.mubr.msk.f32.gmra.mxu1 %vm440_vm1, %v4023_v14  ;;  %3549 = vmatprep.mubr.msk.f32.mxu0 %vm440_vm1, %v4146_v48  ;;  %v374_v14 = vsel %vm345_vm2, %v313_v60, %v314_v6  ;;  %v405_v48 = vrot.slane %v4396_v22, 2 }
  0x53   : > { %3511 = vmatprep.mubr.msk.f32.mxu1 %vm440_vm1, %v4036_v17  ;;  %v401_v17 = vrot.slane %v4160_v53, 2 }
  0x55   : > { %3550 = vmatmul.mubr.msk.f32.gmra.mxu0 %vm440_vm1, %v4160_v53  ;;  %v4568_v30 = vsel %vm406_vm3, %v400_v13, %v401_v17  ;;  %v4577_v39 = vsel %vm406_vm3, %v401_v17, %v402_v18  ;;  %v5253_v53 = vrot.slane %v4388_v12, 1 }
  0x56   : > { %3512 = vmatmul.mubr.msk.f32.gmra.mxu1 %vm440_vm1, %v4058_v24  ;;  %3552 = vmatprep.mubr.msk.f32.mxu0 %vm440_vm1, %v4163_v54  ;;  %v372_v24 = vsel %vm345_vm2, %v315_v10, %v5250_v19 }
  0x57   : > { %3514 = vmatprep.mubr.msk.f32.mxu1 %vm440_vm1, %v4110_v38  ;;  %v404_v38 = vrot.slane %v4352_v49, 2 }
  0x59   : > { %3553 = vmatmul.mubr.msk.f32.gmra.mxu0 %vm440_vm1, %v4388_v12 }
  0x5a   : > { %3515 = vmatmul.mubr.msk.f32.gmra.mxu1 %vm440_vm1, %v4125_v41  ;;  %3555 = vmatprep.mubr.msk.f32.mxu0 %vm440_vm1, %v4352_v49  ;;  %v4589_v41 = vsel %vm406_vm3, %v402_v18, %v403_v5  ;;  %v5260_v49 = vld [vmem:[#allocation8_spill] sm:$0xff] }
  0x5b   : > { %3517 = vmatprep.mubr.msk.f32.mxu1 %vm440_vm1, %v4143_v47  ;;  %v4593_v47 = vsel %vm406_vm3, %v403_v5, %v404_v38 }
  0x5d   : > { %3556 = vmatmul.mubr.msk.f32.gmra.mxu0 %vm440_vm1, %v4396_v22 }
  0x5e   : > { %3518 = vmatmul.mubr.msk.f32.gmra.mxu1 %vm440_vm1, %v4166_v55  ;;  %3598 = vmatprep.mubr.msk.f32.mxu0 %vm440_vm1, %v4048_v20  ;;  %v5254_v55 = vrot.slane %v4163_v54, 1  ;;  %v5256_v54 = vld [vmem:[#allocation4_spill] sm:$0xff] }
  0x5f   : > { %3560 = vmatprep.mubr.msk.f32.mxu1 %vm440_vm1, %v374_v14 }
  0x60   : > { %v348_v57 = vsel %vm345_vm2, %v5254_v55, %v5253_v53  ;;  %vm2857_vm2 = vcmask 982016  }
  0x61   : > { %3599 = vmatmul.mubr.msk.f32.vlgmr.msra.gmra.mxu0 %vm440_vm1, %v4066_v26 }
  0x62   : > { %3561 = vmatmul.mubr.msk.f32.vlgmr.msra.gmra.mxu1 %vm440_vm1, %v373_v15  ;;  %3673 = vmatpush3.msk.msra.mxu0 %vm513_vm0, %v4362_v3 }
  0x63   : > { %3635 = vmatpush3.msk.msra.mxu1 %vm513_vm0, %v4357_v2  ;;  %3563 = vmatprep.mubr.msk.f32.mxu1 %vm440_vm1, %v372_v24 }
  0x64   : > { %3601 = vmatprep.mubr.msk.f32.mxu0 %vm440_vm1, %v4082_v31  ;;  %3710 = vmatprep.subr.msk.mxu1 %vm513_vm0, %v4549_v25 }
  0x65   : > { %3748 = vmatprep.subr.msk.mxu0 %vm513_vm0, %v4554_v29  ;;  %3602 = vmatmul.mubr.msk.f32.gmra.mxu0 %vm440_vm1, %v4097_v34 }
  0x66   : > { %3564 = vmatmul.mubr.msk.f32.gmra.mxu1 %vm440_vm1, %v4048_v20  ;;  %3604 = vmatprep.mubr.msk.f32.mxu0 %vm440_vm1, %v4101_v35  ;;  %v4612_v20 = vsel %vm406_vm3, %v404_v38, %v405_v48 }
  0x67   : > { %3566 = vmatprep.mubr.msk.f32.mxu1 %vm440_vm1, %v4066_v26  ;;  %v376_v26 = vrot.slane %v4278_v44, 2 }
  0x69   : > { %3605 = vmatmul.mubr.msk.f32.gmra.mxu0 %vm440_vm1, %v4122_v40  ;;  %v435_v60 = vsel %vm406_vm3, %v376_v26, %v5255_v61 }
  0x6a   : > { %3567 = vmatmul.mubr.msk.f32.gmra.mxu1 %vm440_vm1, %v4082_v31  ;;  %3607 = vmatprep.mubr.msk.f32.mxu0 %vm440_vm1, %v4129_v42  ;;  %v5251_v31 = vld [vmem:[#allocation2_spill] sm:$0xff] }
  0x6b   : > { %3569 = vmatprep.mubr.msk.f32.mxu1 %vm440_vm1, %v4097_v34 }
  0x6d   : > { %3608 = vmatmul.mubr.msk.f32.gmra.mxu0 %vm440_vm1, %v4133_v43 }
  0x6e   : > { %3570 = vmatmul.mubr.msk.f32.gmra.mxu1 %vm440_vm1, %v4101_v35  ;;  %3610 = vmatprep.mubr.msk.f32.mxu0 %vm440_vm1, %v4175_v59 }
  0x6f   : > { %3572 = vmatprep.mubr.msk.f32.mxu1 %vm440_vm1, %v4122_v40 }
  0x71   : > { %3611 = vmatmul.mubr.msk.f32.gmra.mxu0 %vm440_vm1, %v4199_v9 }
  0x72   : > { %3573 = vmatmul.mubr.msk.f32.gmra.mxu1 %vm440_vm1, %v4129_v42  ;;  %3613 = vmatprep.mubr.msk.f32.mxu0 %vm440_vm1, %v4208_v21 }
  0x73   : > { %3575 = vmatprep.mubr.msk.f32.mxu1 %vm440_vm1, %v4133_v43 }
  0x75   : > { %3614 = vmatmul.mubr.msk.f32.gmra.mxu0 %vm440_vm1, %v4214_v23 }
  0x76   : > { %3576 = vmatmul.mubr.msk.f32.gmra.mxu1 %vm440_vm1, %v4175_v59  ;;  %3616 = vmatprep.mubr.msk.f32.mxu0 %vm440_vm1, %v4089_v33 }
  0x77   : > { %3578 = vmatprep.mubr.msk.f32.mxu1 %vm440_vm1, %v4199_v9 }
  0x79   : > { %3617 = vmatmul.mubr.msk.f32.gmra.mxu0 %vm440_vm1, %v4184_v63 }
  0x7a   : > { %3579 = vmatmul.mubr.msk.f32.gmra.mxu1 %vm440_vm1, %v4208_v21  ;;  %3619 = vmatprep.mubr.msk.f32.mxu0 %vm440_vm1, %v4188_v0 }
  0x7b   : > { %3581 = vmatprep.mubr.msk.f32.mxu1 %vm440_vm1, %v4214_v23 }
  0x7d   : > { %3620 = vmatmul.mubr.msk.f32.gmra.mxu0 %vm440_vm1, %v4218_v27 }
  0x7e   : > { %3582 = vmatmul.mubr.msk.f32.gmra.mxu1 %vm440_vm1, %v4089_v33  ;;  %3622 = vmatprep.mubr.msk.f32.mxu0 %vm440_vm1, %v4226_v36 }
  0x7f   : > { %3584 = vmatprep.mubr.msk.f32.mxu1 %vm440_vm1, %v4184_v63 }
  0x81   : > { %3623 = vmatmul.mubr.msk.f32.gmra.mxu0 %vm440_vm1, %v4236_v45 }
  0x82   : > { %3585 = vmatmul.mubr.msk.f32.gmra.mxu1 %vm440_vm1, %v4188_v0  ;;  %3625 = vmatprep.mubr.msk.f32.mxu0 %vm440_vm1, %v4251_v62 }
  0x83   : > { %3587 = vmatprep.mubr.msk.f32.mxu1 %vm440_vm1, %v4218_v27 }
  0x85   : > { %3626 = vmatmul.mubr.msk.f32.gmra.mxu0 %vm440_vm1, %v4255_v1 }
  0x86   : > { %3588 = vmatmul.mubr.msk.f32.gmra.mxu1 %vm440_vm1, %v4226_v36  ;;  %3628 = vmatprep.mubr.msk.f32.mxu0 %vm440_vm1, %v4259_v56 }
  0x87   : > { %3590 = vmatprep.mubr.msk.f32.mxu1 %vm440_vm1, %v4236_v45 }
  0x89   : > { %3629 = vmatmul.mubr.msk.f32.gmra.mxu0 %vm440_vm1, %v5251_v31 }
  0x8a   : > { %3591 = vmatmul.mubr.msk.f32.gmra.mxu1 %vm440_vm1, %v4251_v62  ;;  %3631 = vmatprep.mubr.msk.f32.mxu0 %vm440_vm1, %v5252_v52 }
  0x8b   : > { %3593 = vmatprep.mubr.msk.f32.mxu1 %vm440_vm1, %v4255_v1 }
  0x8d   : > { %3632 = vmatmul.mubr.msk.f32.gmra.mxu0 %vm440_vm1, %v348_v57 }
  0x8e   : > { %3594 = vmatmul.mubr.msk.f32.gmra.mxu1 %vm440_vm1, %v4259_v56  ;;  %3674 = vmatprep.mubr.msk.f32.mxu0 %vm440_vm1, %v435_v60 }
  0x8f   : > { %3636 = vmatprep.mubr.msk.f32.mxu1 %vm440_vm1, %v4097_v34  ;;  %v5258_v34 = vld [vmem:[#allocation6_spill] sm:$0xff] }
  0x91   : > { %3675 = vmatmul.mubr.msk.f32.vlgmr.msra.gmra.mxu0 %vm440_vm1, %v5256_v54 }
  0x92   : > { %3637 = vmatmul.mubr.msk.f32.vlgmr.msra.gmra.mxu1 %vm440_vm1, %v4101_v35  ;;  %3749 = vmatpush3.msk.msra.mxu0 %vm513_vm0, %v4554_v29  ;;  %v5259_v35 = vld [vmem:[#allocation7_spill] sm:$0xff] }
  0x93   : > { %3711 = vmatpush3.msk.msra.mxu1 %vm513_vm0, %v4549_v25  ;;  %3639 = vmatprep.mubr.msk.f32.mxu1 %vm440_vm1, %v4122_v40  ;;  %v5261_v40 = vld [vmem:[#allocation9_spill] sm:$0xff]  ;;  %vm2853_vm0 = vcmask 850944  }
  0x94   : > { %3677 = vmatprep.mubr.msk.f32.mxu0 %vm440_vm1, %v5257_v32 }
  0x95   : > { %3678 = vmatmul.mubr.msk.f32.gmra.mxu0 %vm440_vm1, %v5258_v34 }
  0x96   : > { %3640 = vmatmul.mubr.msk.f32.gmra.mxu1 %vm440_vm1, %v4129_v42  ;;  %3680 = vmatprep.mubr.msk.f32.mxu0 %vm440_vm1, %v5259_v35  ;;  %v5262_v42 = vld [vmem:[#allocation10_spill] sm:$0xff] }
  0x97   : > { %3642 = vmatprep.mubr.msk.f32.mxu1 %vm440_vm1, %v4133_v43  ;;  %v5263_v43 = vld [vmem:[#allocation11_spill] sm:$0xff] }
  0x99   : > { %3681 = vmatmul.mubr.msk.f32.gmra.mxu0 %vm440_vm1, %v5260_v49 }
  0x9a   : > { %3643 = vmatmul.mubr.msk.f32.gmra.mxu1 %vm440_vm1, %v4175_v59  ;;  %3683 = vmatprep.mubr.msk.f32.mxu0 %vm440_vm1, %v5261_v40  ;;  %v5264_v59 = vld [vmem:[#allocation12_spill] sm:$0xff] }
  0x9b   : > { %3645 = vmatprep.mubr.msk.f32.mxu1 %vm440_vm1, %v4199_v9  ;;  %v5265_v9 = vld [vmem:[#allocation13_spill] sm:$0xff] }
  0x9d   : > { %3684 = vmatmul.mubr.msk.f32.gmra.mxu0 %vm440_vm1, %v5262_v42 }
  0x9e   : > { %3646 = vmatmul.mubr.msk.f32.gmra.mxu1 %vm440_vm1, %v4208_v21  ;;  %3686 = vmatprep.mubr.msk.f32.mxu0 %vm440_vm1, %v5263_v43  ;;  %v5266_v21 = vld [vmem:[#allocation14_spill] sm:$0xff] }
  0x9f   : > { %3648 = vmatprep.mubr.msk.f32.mxu1 %vm440_vm1, %v4214_v23  ;;  %v5267_v23 = vld [vmem:[#allocation15_spill] sm:$0xff] }
  0xa1   : > { %3687 = vmatmul.mubr.msk.f32.gmra.mxu0 %vm440_vm1, %v5264_v59 }
  0xa2   : > { %3649 = vmatmul.mubr.msk.f32.gmra.mxu1 %vm440_vm1, %v4089_v33  ;;  %3689 = vmatprep.mubr.msk.f32.mxu0 %vm440_vm1, %v5265_v9  ;;  %v5268_v33 = vld [vmem:[#allocation16_spill] sm:$0xff] }
  0xa3   : > { %3651 = vmatprep.mubr.msk.f32.mxu1 %vm440_vm1, %v4184_v63  ;;  %v5269_v63 = vld [vmem:[#allocation17_spill] sm:$0xff] }
  0xa5   : > { %3690 = vmatmul.mubr.msk.f32.gmra.mxu0 %vm440_vm1, %v5266_v21 }
  0xa6   : > { %3652 = vmatmul.mubr.msk.f32.gmra.mxu1 %vm440_vm1, %v4188_v0  ;;  %3692 = vmatprep.mubr.msk.f32.mxu0 %vm440_vm1, %v5267_v23  ;;  %v5270_v0 = vld [vmem:[#allocation18_spill] sm:$0xff] }
  0xa7   : > { %3654 = vmatprep.mubr.msk.f32.mxu1 %vm440_vm1, %v4218_v27  ;;  %v5271_v27 = vld [vmem:[#allocation19_spill] sm:$0xff] }
  0xa9   : > { %3693 = vmatmul.mubr.msk.f32.gmra.mxu0 %vm440_vm1, %v5268_v33 }
  0xaa   : > { %3655 = vmatmul.mubr.msk.f32.gmra.mxu1 %vm440_vm1, %v4226_v36  ;;  %3695 = vmatprep.mubr.msk.f32.mxu0 %vm440_vm1, %v5269_v63  ;;  %v5272_v36 = vld [vmem:[#allocation20_spill] sm:$0xff] }
  0xab   : > { %3657 = vmatprep.mubr.msk.f32.mxu1 %vm440_vm1, %v4236_v45  ;;  %v5273_v45 = vld [vmem:[#allocation21_spill] sm:$0xff] }
  0xad   : > { %3696 = vmatmul.mubr.msk.f32.gmra.mxu0 %vm440_vm1, %v5270_v0 }
  0xae   : > { %3658 = vmatmul.mubr.msk.f32.gmra.mxu1 %vm440_vm1, %v4251_v62  ;;  %3698 = vmatprep.mubr.msk.f32.mxu0 %vm440_vm1, %v5271_v27  ;;  %v5274_v62 = vld [vmem:[#allocation22_spill] sm:$0xff] }
  0xaf   : > { %3660 = vmatprep.mubr.msk.f32.mxu1 %vm440_vm1, %v4255_v1 }
  0xb1   : > { %3699 = vmatmul.mubr.msk.f32.gmra.mxu0 %vm440_vm1, %v5272_v36 }
  0xb2   : > { %3661 = vmatmul.mubr.msk.f32.gmra.mxu1 %vm440_vm1, %v4259_v56  ;;  %3701 = vmatprep.mubr.msk.f32.mxu0 %vm440_vm1, %v5273_v45 }
  0xb3   : > { %3663 = vmatprep.mubr.msk.f32.mxu1 %vm440_vm1, %v5251_v31 }
  0xb5   : > { %3702 = vmatmul.mubr.msk.f32.gmra.mxu0 %vm440_vm1, %v5274_v62 }
  0xb6   : > { %3664 = vmatmul.mubr.msk.f32.gmra.mxu1 %vm440_vm1, %v5252_v52  ;;  %3704 = vmatprep.mubr.msk.f32.mxu0 %vm440_vm1, %v4425_v58 }
  0xb7   : > { %3666 = vmatprep.mubr.msk.f32.mxu1 %vm440_vm1, %v348_v57 }
  0xb9   : > { %3705 = vmatmul.mubr.msk.f32.gmra.mxu0 %vm440_vm1, %v4431_v7 }
  0xba   : > { %3667 = vmatmul.mubr.msk.f32.gmra.mxu1 %vm440_vm1, %v4420_v46  ;;  %3707 = vmatprep.mubr.msk.f32.mxu0 %vm440_vm1, %v4452_v11 }
  0xbb   : > { %3669 = vmatprep.mubr.msk.f32.mxu1 %vm440_vm1, %v4439_v16 }
  0xbd   : > { %3708 = vmatmul.mubr.msk.f32.gmra.mxu0 %vm440_vm1, %v4458_v28 }
  0xbe   : > { %3670 = vmatmul.mubr.msk.f32.gmra.mxu1 %vm440_vm1, %v4448_v37  ;;  %3750 = vmatprep.mubr.msk.f32.mxu0 %vm440_vm1, %v5261_v40 }
  0xbf   : > { %3712 = vmatprep.mubr.msk.f32.mxu1 %vm440_vm1, %v5258_v34 }
  0xc1   : > { %3751 = vmatmul.mubr.msk.f32.vlgmr.msra.gmra.mxu0 %vm440_vm1, %v5262_v42 }
  0xc2   : > { %3713 = vmatmul.mubr.msk.f32.vlgmr.msra.gmra.mxu1 %vm440_vm1, %v5259_v35  ;;  %3753 = vmatprep.mubr.msk.f32.mxu0 %vm440_vm1, %v5263_v43 }
  0xc3   : > { %3715 = vmatprep.mubr.msk.f32.mxu1 %vm440_vm1, %v5260_v49 }
  0xc5   : > { %3754 = vmatmul.mubr.msk.f32.gmra.mxu0 %vm440_vm1, %v5264_v59 }
  0xc6   : > { %3716 = vmatmul.mubr.msk.f32.gmra.mxu1 %vm440_vm1, %v5261_v40  ;;  %3756 = vmatprep.mubr.msk.f32.mxu0 %vm440_vm1, %v5265_v9 }
  0xc7   : > { %3718 = vmatprep.mubr.msk.f32.mxu1 %vm440_vm1, %v5262_v42 }
  0xc9   : > { %3757 = vmatmul.mubr.msk.f32.gmra.mxu0 %vm440_vm1, %v5266_v21 }
  0xca   : > { %3719 = vmatmul.mubr.msk.f32.gmra.mxu1 %vm440_vm1, %v5263_v43  ;;  %3759 = vmatprep.mubr.msk.f32.mxu0 %vm440_vm1, %v5267_v23 }
  0xcb   : > { %3721 = vmatprep.mubr.msk.f32.mxu1 %vm440_vm1, %v5264_v59 }
  0xcd   : > { %3760 = vmatmul.mubr.msk.f32.gmra.mxu0 %vm440_vm1, %v5268_v33 }
  0xce   : > { %3722 = vmatmul.mubr.msk.f32.gmra.mxu1 %vm440_vm1, %v5265_v9  ;;  %3762 = vmatprep.mubr.msk.f32.mxu0 %vm440_vm1, %v5269_v63 }
  0xcf   : > { %3724 = vmatprep.mubr.msk.f32.mxu1 %vm440_vm1, %v5266_v21 }
  0xd1   : > { %3763 = vmatmul.mubr.msk.f32.gmra.mxu0 %vm440_vm1, %v5270_v0 }
  0xd2   : > { %3725 = vmatmul.mubr.msk.f32.gmra.mxu1 %vm440_vm1, %v5267_v23  ;;  %3765 = vmatprep.mubr.msk.f32.mxu0 %vm440_vm1, %v5271_v27 }
  0xd3   : > { %3727 = vmatprep.mubr.msk.f32.mxu1 %vm440_vm1, %v5268_v33 }
  0xd5   : > { %3766 = vmatmul.mubr.msk.f32.gmra.mxu0 %vm440_vm1, %v5272_v36 }
  0xd6   : > { %3728 = vmatmul.mubr.msk.f32.gmra.mxu1 %vm440_vm1, %v5269_v63  ;;  %3768 = vmatprep.mubr.msk.f32.mxu0 %vm440_vm1, %v5273_v45 }
  0xd7   : > { %3730 = vmatprep.mubr.msk.f32.mxu1 %vm440_vm1, %v5270_v0 }
  0xd9   : > { %v3448_v1 = vpop.f32.mrf.mxu0  ;;  %3769 = vmatmul.mubr.msk.f32.gmra.mxu0 %vm440_vm1, %v5274_v62 }
  0xda   : > { %v4840_v56 = vpop.f32.mrf.mxu1  ;;  %3731 = vmatmul.mubr.msk.f32.gmra.mxu1 %vm440_vm1, %v5271_v27  ;;  %3771 = vmatprep.mubr.msk.f32.mxu0 %vm440_vm1, %v4425_v58 }
  0xdb   : > { %3733 = vmatprep.mubr.msk.f32.mxu1 %vm440_vm1, %v5272_v36  ;;  %v583_v2 = vpop.f32.mrf.mxu0 }
  0xdc   : > { %v4850_v3 = vpop.f32.mrf.mxu1 }
  0xdd   : > { %v3451_v13 = vpop.f32.mrf.mxu0  ;;  %3772 = vmatmul.mubr.msk.f32.gmra.mxu0 %vm440_vm1, %v4431_v7 }
  0xde   : > { %v4852_v12 = vpop.f32.mrf.mxu1  ;;  %3734 = vmatmul.mubr.msk.f32.gmra.mxu1 %vm440_vm1, %v5273_v45  ;;  %3774 = vmatprep.mubr.msk.f32.mxu0 %vm440_vm1, %v4452_v11 }
  0xdf   : > { %3736 = vmatprep.mubr.msk.f32.mxu1 %vm440_vm1, %v5274_v62  ;;  %v593_v50 = vpop.f32.mrf.mxu0 }
  0xe0   : > { %v649_v51 = vpop.f32.mrf.mxu1 }
  0xe1   : > { %v3454_v46 = vpop.f32.mrf.mxu0  ;;  %3775 = vmatmul.mubr.msk.f32.gmra.mxu0 %vm440_vm1, %v4458_v28 }
  0xe2   : > { %v3472_v16 = vpop.f32.mrf.mxu1  ;;  %3737 = vmatmul.mubr.msk.f32.gmra.mxu1 %vm440_vm1, %v4425_v58  ;;  %3777 = vmatprep.mubr.msk.f32.mxu0 %vm440_vm1, %v4568_v30 }
  0xe3   : > { %3739 = vmatprep.mubr.msk.f32.mxu1 %vm440_vm1, %v4431_v7  ;;  %v602_v8 = vpop.f32.mrf.mxu0 }
  0xe4   : > { %v4870_v37 = vpop.f32.mrf.mxu1 }
  0xe5   : > { %v3457_v6 = vpop.f32.mrf.mxu0  ;;  %3778 = vmatmul.mubr.msk.f32.gmra.mxu0 %vm440_vm1, %v4577_v39 }
  0xe6   : > { %v4872_v10 = vpop.f32.mrf.mxu1  ;;  %3740 = vmatmul.mubr.msk.f32.gmra.mxu1 %vm440_vm1, %v4452_v11  ;;  %3780 = vmatprep.mubr.msk.f32.mxu0 %vm440_vm1, %v4589_v41  ;;  %v436_v11 = vsel %vm406_vm3, %v405_v48, %v376_v26 }
  0xe7   : > { %3742 = vmatprep.mubr.msk.f32.mxu1 %vm440_vm1, %v4458_v28  ;;  %v611_v58 = vpop.f32.mrf.mxu0 }
  0xe8   : > { %v4882_v7 = vpop.f32.mrf.mxu1 }
  0xe9   : > { %v3460_v14 = vpop.f32.mrf.mxu0  ;;  %3781 = vmatmul.mubr.msk.f32.gmra.mxu0 %vm440_vm1, %v4593_v47 }
  0xea   : > { %v4884_v15 = vpop.f32.mrf.mxu1  ;;  %3743 = vmatmul.mubr.msk.f32.gmra.mxu1 %vm440_vm1, %v4568_v30  ;;  %3783 = vmatprep.mubr.msk.f32.mxu0 %vm440_vm1, %v4612_v20 }
  0xeb   : > { %3745 = vmatprep.mubr.msk.f32.mxu1 %vm440_vm1, %v4577_v39  ;;  %v621_v28 = vpop.f32.mrf.mxu0 }
  0xec   : > { %v677_v17 = vpop.f32.mrf.mxu1 }
  0xed   : > { %v3463_v18 = vpop.f32.mrf.mxu0  ;;  %3784 = vmatmul.mubr.msk.f32.gmra.mxu0 %vm440_vm1, %v436_v11 }
  0xee   : > { %v3481_v19 = vpop.f32.mrf.mxu1  ;;  %3746 = vmatmul.mubr.msk.f32.gmra.mxu1 %vm440_vm1, %v4589_v41  ;;  %vm2855_vm1 = vcmask 916480  }
  0xef   : > { %v630_v24 = vpop.f32.mrf.mxu0 }
  0xf0   : > { %v4903_v25 = vpop.f32.mrf.mxu1 }
  0xf1   : > { %v3524_v5 = vpop.f32.mrf.mxu0 }
  0xf2   : > { %v3486_v29 = vpop.f32.mrf.mxu1 }
  0xf3   : > { %v778_v44 = vadd.f32 %v3486_v29, %v3448_v1  ;;  %v963_v22 = vpop.f32.mrf.mxu0 }
  0xf4   : > { %v772_v30 = vpop.f32.mrf.mxu1 }
  0xf5   : > { %v4905_v38 = vadd.f32 %v3524_v5, %v778_v44  ;;  %v773_v39 = vadd.f32 %v772_v30, %v583_v2  ;;  %v3527_v48 = vpop.f32.mrf.mxu0 }
  0xf6   : > { %v3489_v47 = vpop.f32.mrf.mxu1 }
  0xf7   : > { %v4907_v20 = vadd.f32 %v963_v22, %v773_v39  ;;  %v787_v26 = vadd.f32 %v3489_v47, %v3451_v13  ;;  %v973_v41 = vpop.f32.mrf.mxu0 }
  0xf8   : > { %v782_v31 = vpop.f32.mrf.mxu1 }
  0xf9   : > { %v4909_v52 = vadd.f32 %v3527_v48, %v787_v26  ;;  %v3530_v55 = vpop.f32.mrf.mxu0 }
  0xfa   : > { %v3492_v53 = vpop.f32.mrf.mxu1 }
  0xfb   : > { %v982_v61 = vpop.f32.mrf.mxu0 }
  0xfc   : > { %v791_v57 = vpop.f32.mrf.mxu1 }
  0xfd   : > { %v792_v60 = vadd.f32 %v791_v57, %v602_v8  ;;  %v3533_v32 = vpop.f32.mrf.mxu0 }
  0xfe   : > { %v3495_v54 = vpop.f32.mrf.mxu1 }
  0xff   : > { %v4911_v34 = vadd.f32 %v982_v61, %v792_v60  ;;  %v806_v35 = vadd.f32 %v3495_v54, %v3457_v6  ;;  %v991_v40 = vpop.f32.mrf.mxu0 }
 0x100   : > { %v800_v49 = vpop.f32.mrf.mxu1 }
 0x101   : > { %v4913_v42 = vadd.f32 %v3533_v32, %v806_v35  ;;  %v801_v43 = vadd.f32 %v800_v49, %v611_v58  ;;  %v3536_v9 = vpop.f32.mrf.mxu0 }
 0x102   : > { %v3498_v59 = vpop.f32.mrf.mxu1 }
 0x103   : > { %v4915_v21 = vadd.f32 %v991_v40, %v801_v43  ;;  %v815_v23 = vadd.f32 %v3498_v59, %v3460_v14  ;;  %v1001_v63 = vpop.f32.mrf.mxu0 }
 0x104   : > { %v810_v33 = vpop.f32.mrf.mxu1 }
 0x105   : > { %v4917_v0 = vadd.f32 %v3536_v9, %v815_v23  ;;  %v3539_v36 = vpop.f32.mrf.mxu0 }
 0x106   : > { %v3501_v27 = vpop.f32.mrf.mxu1 }
 0x107   : > { %v1010_v62 = vpop.f32.mrf.mxu0 }
 0x108   : > { %v819_v45 = vpop.f32.mrf.mxu1 }
 0x109   : > { %v820_v1 = vadd.f32 %v819_v45, %v630_v24  ;;  %v3542_v13 = vpop.f32.mrf.mxu0 }
 0x10a   : > { %v3504_v2 = vpop.f32.mrf.mxu1 }
 0x10b   : > { %v4919_v50 = vadd.f32 %v1010_v62, %v820_v1  ;;  %v834_v51 = vadd.f32 %v3504_v2, %v4840_v56  ;;  %v1019_v16 = vpop.f32.mrf.mxu0 }
 0x10c   : > { %v828_v46 = vpop.f32.mrf.mxu1 }
 0x10d   : > { %v4922_v8 = vadd.f32 %v3542_v13, %v834_v51  ;;  %v829_v6 = vadd.f32 %v828_v46, %v4850_v3  ;;  %v3545_v14 = vpop.f32.mrf.mxu0 }
 0x10e   : > { %v3507_v58 = vpop.f32.mrf.mxu1 }
 0x10f   : > { %v4925_v11 = vadd.f32 %v1019_v16, %v829_v6  ;;  %v843_v28 = vadd.f32 %v3507_v58, %v4852_v12  ;;  %v1029_v18 = vpop.f32.mrf.mxu0 }
 0x110   : > { %v838_v17 = vpop.f32.mrf.mxu1 }
 0x111   : > { %v4928_v19 = vadd.f32 %v3545_v14, %v843_v28  ;;  %v3548_v29 = vpop.f32.mrf.mxu0 }
 0x112   : > { %v3510_v24 = vpop.f32.mrf.mxu1 }
 0x113   : > { %v1038_v56 = vpop.f32.mrf.mxu0 }
 0x114   : > { %v847_v5 = vpop.f32.mrf.mxu1 }
 0x115   : > { %v848_v44 = vadd.f32 %v847_v5, %v4870_v37  ;;  %v3551_v22 = vpop.f32.mrf.mxu0 }
 0x116   : > { %v3513_v30 = vpop.f32.mrf.mxu1 }
 0x117   : > { %v4931_v39 = vadd.f32 %v1038_v56, %v848_v44  ;;  %v862_v3 = vadd.f32 %v3513_v30, %v4872_v10  ;;  %v1047_v48 = vpop.f32.mrf.mxu0 }
 0x118   : > { %v856_v47 = vpop.f32.mrf.mxu1 }
 0x119   : > { %v4934_v26 = vadd.f32 %v3551_v22, %v862_v3  ;;  %v857_v12 = vadd.f32 %v856_v47, %v4882_v7  ;;  %v3554_v41 = vpop.f32.mrf.mxu0 }
 0x11a   : > { %v3516_v31 = vpop.f32.mrf.mxu1 }
 0x11b   : > { %v4937_v53 = vadd.f32 %v1047_v48, %v857_v12  ;;  %v871_v55 = vadd.f32 %v3516_v31, %v4884_v15  ;;  %v1057_v37 = vpop.f32.mrf.mxu0 }
 0x11c   : > { %v866_v57 = vpop.f32.mrf.mxu1 }
 0x11d   : > { %v4940_v61 = vadd.f32 %v3554_v41, %v871_v55  ;;  %v3557_v54 = vpop.f32.mrf.mxu0 }
 0x11e   : > { %v3519_v60 = vpop.f32.mrf.mxu1 }
 0x11f   : > { %v1066_v10 = vpop.f32.mrf.mxu0 }
 0x120   : > { %v875_v32 = vpop.f32.mrf.mxu1 }
 0x121   : > { %v876_v35 = vadd.f32 %v875_v32, %v4903_v25  ;;  %v3600_v40 = vpop.f32.mrf.mxu0 }
 0x122   : > { %v3562_v49 = vpop.f32.mrf.mxu1 }
 0x123   : > { %v4943_v43 = vadd.f32 %v1066_v10, %v876_v35  ;;  %v1345_v7 = vadd.f32 %v3562_v49, %v4905_v38  ;;  %v1440_v9 = vpop.f32.mrf.mxu0 }
 0x124   : > { %v1233_v59 = vpop.f32.mrf.mxu1 }
 0x125   : > { %v4946_v23 = vadd.f32 %v3600_v40, %v1345_v7  ;;  %v1344_v15 = vadd.f32 %v1233_v59, %v4907_v20  ;;  %v3603_v63 = vpop.f32.mrf.mxu0 }
 0x126   : > { %v3565_v33 = vpop.f32.mrf.mxu1 }
 0x127   : > { %v4949_v27 = vadd.f32 %v1440_v9, %v1344_v15  ;;  %v1346_v36 = vadd.f32 %v3565_v33, %v4909_v52  ;;  %v1450_v25 = vpop.f32.mrf.mxu0 }
 0x128   : > { %v1243_v45 = vpop.f32.mrf.mxu1 }
 0x129   : > { %v4952_v62 = vadd.f32 %v3603_v63, %v1346_v36  ;;  %v3606_v2 = vpop.f32.mrf.mxu0 }
 0x12a   : > { %v3568_v1 = vpop.f32.mrf.mxu1 }
 0x12b   : > { %v1459_v38 = vpop.f32.mrf.mxu0 }
 0x12c   : > { %v1252_v13 = vpop.f32.mrf.mxu1 }
 0x12d   : > { %v1347_v51 = vadd.f32 %v1252_v13, %v4911_v34  ;;  %v3609_v16 = vpop.f32.mrf.mxu0 }
 0x12e   : > { %v3571_v46 = vpop.f32.mrf.mxu1 }
 0x12f   : > { %v4955_v6 = vadd.f32 %v1459_v38, %v1347_v51  ;;  %v1349_v20 = vadd.f32 %v3571_v46, %v4913_v42  ;;  %v1468_v14 = vpop.f32.mrf.mxu0 }
 0x130   : > { %v1261_v58 = vpop.f32.mrf.mxu1 }
 0x131   : > { %v4958_v28 = vadd.f32 %v3609_v16, %v1349_v20  ;;  %v1348_v52 = vadd.f32 %v1261_v58, %v4915_v21  ;;  %v3612_v18 = vpop.f32.mrf.mxu0 }
 0x132   : > { %v3574_v17 = vpop.f32.mrf.mxu1 }
 0x133   : > { %v4961_v24 = vadd.f32 %v1468_v14, %v1348_v52  ;;  %v1350_v29 = vadd.f32 %v3574_v17, %v4917_v0  ;;  %v1478_v34 = vpop.f32.mrf.mxu0 }
 0x134   : > { %v1271_v5 = vpop.f32.mrf.mxu1 }
 0x135   : > { %v4964_v56 = vadd.f32 %v3612_v18, %v1350_v29  ;;  %v3615_v30 = vpop.f32.mrf.mxu0 }
 0x136   : > { %v3577_v44 = vpop.f32.mrf.mxu1 }
 0x137   : > { %v1487_v42 = vpop.f32.mrf.mxu0 }
 0x138   : > { %v1280_v22 = vpop.f32.mrf.mxu1 }
 0x139   : > { %v1351_v3 = vadd.f32 %v1280_v22, %v4919_v50  ;;  %v3618_v48 = vpop.f32.mrf.mxu0 }
 0x13a   : > { %v3580_v47 = vpop.f32.mrf.mxu1 }
 0x13b   : > { %v4967_v12 = vadd.f32 %v1487_v42, %v1351_v3  ;;  %v1353_v21 = vadd.f32 %v3580_v47, %v4922_v8  ;;  %v1496_v41 = vpop.f32.mrf.mxu0 }
 0x13c   : > { %v1289_v31 = vpop.f32.mrf.mxu1 }
 0x13d   : > { %v4970_v55 = vadd.f32 %v3618_v48, %v1353_v21  ;;  %v1352_v0 = vadd.f32 %v1289_v31, %v4925_v11  ;;  %v3621_v37 = vpop.f32.mrf.mxu0 }
 0x13e   : > { %v3583_v57 = vpop.f32.mrf.mxu1 }
 0x13f   : > { %v4973_v60 = vadd.f32 %v1496_v41, %v1352_v0  ;;  %v1354_v54 = vadd.f32 %v3583_v57, %v4928_v19  ;;  %v1506_v50 = vpop.f32.mrf.mxu0 }
 0x140   : > { %v1299_v32 = vpop.f32.mrf.mxu1 }
 0x141   : > { %v4976_v10 = vadd.f32 %v3621_v37, %v1354_v54  ;;  %v3624_v49 = vpop.f32.mrf.mxu0 }
 0x142   : > { %v3586_v35 = vpop.f32.mrf.mxu1 }
 0x143   : > { %v1515_v8 = vpop.f32.mrf.mxu0 }
 0x144   : > { %v1308_v40 = vpop.f32.mrf.mxu1 }
 0x145   : > { %v1355_v7 = vadd.f32 %v1308_v40, %v4931_v39  ;;  %v3627_v9 = vpop.f32.mrf.mxu0 }
 0x146   : > { %v3589_v59 = vpop.f32.mrf.mxu1 }
 0x147   : > { %v4979_v15 = vadd.f32 %v1515_v8, %v1355_v7  ;;  %v1357_v11 = vadd.f32 %v3589_v59, %v4934_v26  ;;  %v1524_v63 = vpop.f32.mrf.mxu0 }
 0x148   : > { %v1317_v33 = vpop.f32.mrf.mxu1 }
 0x149   : > { %v4982_v36 = vadd.f32 %v3627_v9, %v1357_v11  ;;  %v1356_v19 = vadd.f32 %v1317_v33, %v4937_v53  ;;  %v3630_v25 = vpop.f32.mrf.mxu0 }
 0x14a   : > { %v3592_v45 = vpop.f32.mrf.mxu1 }
 0x14b   : > { %v4985_v1 = vadd.f32 %v1524_v63, %v1356_v19  ;;  %v1358_v2 = vadd.f32 %v3592_v45, %v4940_v61  ;;  %v1534_v39 = vpop.f32.mrf.mxu0 }
 0x14c   : > { %v1327_v13 = vpop.f32.mrf.mxu1 }
 0x14d   : > { %v4988_v38 = vadd.f32 %v3630_v25, %v1358_v2  ;;  %v3633_v46 = vpop.f32.mrf.mxu0 }
 0x14e   : > { %v3595_v51 = vpop.f32.mrf.mxu1 }
 0x14f   : > { %v1543_v26 = vpop.f32.mrf.mxu0 }
 0x150   : > { %v1336_v16 = vpop.f32.mrf.mxu1 }
 0x151   : > { %v1359_v20 = vadd.f32 %v1336_v16, %v4943_v43  ;;  %v3676_v14 = vpop.f32.mrf.mxu0 }
 0x152   : > { %v3638_v58 = vpop.f32.mrf.mxu1 }
 0x153   : > { %v4991_v52 = vadd.f32 %v1543_v26, %v1359_v20  ;;  %v1759_v53 = vadd.f32 %v3638_v58, %v4946_v23  ;;  %v1917_v18 = vpop.f32.mrf.mxu0 }
 0x154   : > { %v1647_v17 = vpop.f32.mrf.mxu1 }
 0x155   : > { %v4994_v29 = vadd.f32 %v3676_v14, %v1759_v53  ;;  %v1758_v61 = vadd.f32 %v1647_v17, %v4949_v27  ;;  %v3679_v34 = vpop.f32.mrf.mxu0 }
 0x156   : > { %v3641_v5 = vpop.f32.mrf.mxu1 }
 0x157   : > { %v4997_v44 = vadd.f32 %v1917_v18, %v1758_v61  ;;  %v1760_v30 = vadd.f32 %v3641_v5, %v4952_v62  ;;  %v1927_v43 = vpop.f32.mrf.mxu0 }
 0x158   : > { %v1657_v22 = vpop.f32.mrf.mxu1 }
 0x159   : > { %v5000_v42 = vadd.f32 %v3679_v34, %v1760_v30  ;;  %v3682_v47 = vpop.f32.mrf.mxu0 }
 0x15a   : > { %v3644_v3 = vpop.f32.mrf.mxu1 }
 0x15b   : > { %v1936_v23 = vpop.f32.mrf.mxu0 }
 0x15c   : > { %v1666_v48 = vpop.f32.mrf.mxu1 }
 0x15d   : > { %v1761_v21 = vadd.f32 %v1666_v48, %v4955_v6  ;;  %v3685_v41 = vpop.f32.mrf.mxu0 }
 0x15e   : > { %v3647_v31 = vpop.f32.mrf.mxu1 }
 0x15f   : > { %v5003_v0 = vadd.f32 %v1936_v23, %v1761_v21  ;;  %v1763_v27 = vadd.f32 %v3647_v31, %v4958_v28  ;;  %v1945_v37 = vpop.f32.mrf.mxu0 }
 0x160   : > { %v1675_v57 = vpop.f32.mrf.mxu1 }
 0x161   : > { %v5006_v54 = vadd.f32 %v3685_v41, %v1763_v27  ;;  %v1762_v62 = vadd.f32 %v1675_v57, %v4961_v24  ;;  %v3688_v50 = vpop.f32.mrf.mxu0 }
 0x162   : > { %v3650_v32 = vpop.f32.mrf.mxu1 }
 0x163   : > { %v5009_v35 = vadd.f32 %v1945_v37, %v1762_v62  ;;  %v1764_v49 = vadd.f32 %v3650_v32, %v4964_v56  ;;  %v1955_v6 = vpop.f32.mrf.mxu0 }
 0x164   : > { %v1685_v40 = vpop.f32.mrf.mxu1  ;;  %v5052_v6 = vld [vmem:[%s5204_s3] ss:$0 sm:$0xff] }
 0x165   : > { %v5012_v8 = vadd.f32 %v3688_v50, %v1764_v49  ;;  %v3691_v59 = vpop.f32.mrf.mxu0 }
 0x166   : > { %v3653_v7 = vpop.f32.mrf.mxu1 }
 0x167   : > { %v1964_v28 = vpop.f32.mrf.mxu0 }
 0x168   : > { %v1694_v9 = vpop.f32.mrf.mxu1 }
 0x169   : > { %v1765_v11 = vadd.f32 %v1694_v9, %v4967_v12  ;;  %v3694_v63 = vpop.f32.mrf.mxu0 }
 0x16a   : > { %v3656_v33 = vpop.f32.mrf.mxu1 }
 0x16b   : > { %v5015_v19 = vadd.f32 %v1964_v28, %v1765_v11  ;;  %v1767_v24 = vadd.f32 %v3656_v33, %v4970_v55  ;;  %v5020_v25 = vpop.f32.mrf.mxu0 }
 0x16c   : > { %v5018_v45 = vpop.f32.mrf.mxu1 }
 0x16d   : > { %v5022_v56 = vadd.f32 %v3694_v63, %v1767_v24  ;;  %v5026_v13 = vpop.f32.mrf.mxu0 }
 0x16e   : > { %v5024_v2 = vpop.f32.mrf.mxu1 }
 0x16f   : > { %v1983_v51 = vpop.f32.mrf.mxu0 }
 0x170   : > { %v1713_v39 = vpop.f32.mrf.mxu1 }
 0x171   : > { %v3700_v12 = vpop.f32.mrf.mxu0 }
 0x172   : > { %v3662_v46 = vpop.f32.mrf.mxu1  ;;  %v3888_v12 = vmov 1983009808  }
 0x173   : > { %v1992_v26 = vpop.f32.mrf.mxu0 }
 0x174   : > { %v1722_v16 = vpop.f32.mrf.mxu1 }
 0x175   : > { %v1769_v20 = vadd.f32 %v1722_v16, %v4979_v15  ;;  %v5031_v55 = vpop.f32.mrf.mxu0  ;;  %v2500_v16 = vunpack.c.l.s4 %v3888_v12 }
 0x176   : > { %v5029_v58 = vpop.f32.mrf.mxu1 }
 0x177   : > { %v5033_v14 = vadd.f32 %v1992_v26, %v1769_v20  ;;  %v5037_v17 = vpop.f32.mrf.mxu0 }
 0x178   : > { %v5035_v53 = vpop.f32.mrf.mxu1 }
 0x179   : > { %v5041_v61 = vpop.f32.mrf.mxu0 }
 0x17a   : > { %v5039_v18 = vpop.f32.mrf.mxu1 }
 0x17b   : > { %v2011_v34 = vpop.f32.mrf.mxu0 }
 0x17c   : > { %v1741_v5 = vpop.f32.mrf.mxu1 }
 0x17d   : > { %v3709_v22 = vpop.f32.mrf.mxu0 }
 0x17e   : > { %v3671_v30 = vpop.f32.mrf.mxu1 }
 0x17f   : > { %v5045_v15 = vpop.f32.mrf.mxu0 }
 0x180   : > { %v5043_v43 = vpop.f32.mrf.mxu1 }
 0x181   : > { %v3752_v47 = vpop.f32.mrf.mxu0 }
 0x182   : > { %v3714_v3 = vpop.f32.mrf.mxu1 }
 0x183   : > { %v2331_v23 = vpop.f32.mrf.mxu0  ;;  %v2236_v57 = vadd.f32 %v3714_v3, %v4994_v29 }
 0x184   : > { %v2124_v48 = vpop.f32.mrf.mxu1 }
 0x185   : > { %v3755_v31 = vpop.f32.mrf.mxu0  ;;  %v2235_v37 = vadd.f32 %v2124_v48, %v4997_v44  ;;  %v2443_v40 = vadd.f32 %v3752_v47, %v2236_v57 }
 0x186   : > { %v3717_v21 = vpop.f32.mrf.mxu1 }
 0x187   : > { %v2341_v27 = vpop.f32.mrf.mxu0  ;;  %v2442_v7 = vadd.f32 %v2331_v23, %v2235_v37  ;;  %v2237_v59 = vadd.f32 %v3717_v21, %v5000_v42  ;;  %v2466_v44 = vadd.f32 %v5052_v6, %v2443_v40  ;;  %v2501_v21 = vunpack.c.0.s8 %v2500_v16 }
 0x188   : > { %v2134_v41 = vpop.f32.mrf.mxu1 }
 0x189   : > { %v3758_v32 = vpop.f32.mrf.mxu0  ;;  %v2465_v39 = vadd.f32 %v5052_v6, %v2442_v7  ;;  %v2444_v51 = vadd.f32 %v3755_v31, %v2237_v59  ;;  %v2482_v22 = vmax.f32 %v2466_v44, 0.0 }
 0x18a   : > { %v3720_v62 = vpop.f32.mrf.mxu1 }
 0x18b   : > { %v2350_v49 = vpop.f32.mrf.mxu0  ;;  %v2481_v48 = vmax.f32 %v2465_v39, 0.0  ;;  %v2467_v23 = vadd.f32 %v5052_v6, %v2444_v51 }
 0x18c   : > { %v2143_v50 = vpop.f32.mrf.mxu1 }
 0x18d   : > { %v3761_v28 = vpop.f32.mrf.mxu0  ;;  %v2238_v46 = vadd.f32 %v2143_v50, %v5003_v0  ;;  %v2483_v7 = vmax.f32 %v2467_v23, 0.0 }
 0x18e   : > { %v3723_v9 = vpop.f32.mrf.mxu1 }
 0x18f   : > { %v2240_v11 = vadd.f32 %v3723_v9, %v5006_v54  ;;  %v2359_v33 = vpop.f32.mrf.mxu0  ;;  %v2445_v0 = vadd.f32 %v2350_v49, %v2238_v46  ;;  %v1766_v49 = vadd.f32 %v5018_v45, %v4973_v60 }
 0x190   : > { %v2152_v29 = vpop.f32.mrf.mxu1 }
 0x191   : > { %v2447_v63 = vadd.f32 %v3761_v28, %v2240_v11  ;;  %v2239_v24 = vadd.f32 %v2152_v29, %v5009_v35  ;;  %v3764_v42 = vpop.f32.mrf.mxu0  ;;  %v2468_v29 = vadd.f32 %v5052_v6, %v2445_v0 }
 0x192   : > { %v3726_v26 = vpop.f32.mrf.mxu1 }
 0x193   : > { %v2470_v20 = vadd.f32 %v5052_v6, %v2447_v63  ;;  %v2446_v5 = vadd.f32 %v2359_v33, %v2239_v24  ;;  %v2241_v54 = vadd.f32 %v3726_v26, %v5012_v8  ;;  %v2369_v30 = vpop.f32.mrf.mxu0  ;;  %v5070_v33 = vsub.s32 %v2501_v21, %v3981_v4 }
 0x194   : > { %v2162_v34 = vpop.f32.mrf.mxu1 }
 0x195   : > { %v2486_v3 = vmax.f32 %v2470_v20, 0.0  ;;  %v2469_v35 = vadd.f32 %v5052_v6, %v2446_v5  ;;  %v2448_v47 = vadd.f32 %v3764_v42, %v2241_v54  ;;  %v3767_v41 = vpop.f32.mrf.mxu0  ;;  %v2036_v42 = vadd.f32 %v5020_v25, %v1766_v49 }
 0x196   : > { %v3729_v31 = vpop.f32.mrf.mxu1  ;;  %v1768_v20 = vadd.f32 %v5024_v2, %v4976_v10  ;;  %v1771_v5 = vadd.f32 %v5029_v58, %v4982_v36  ;;  %v2484_v54 = vmax.f32 %v2468_v29, 0.0 }
 0x197   : > { %v2633_v27 = vcombine.low %v2482_v22, %v2486_v3  ;;  %v2634_v57 = vcombine.high %v2482_v22, %v2486_v3  ;;  %v2485_v37 = vmax.f32 %v2469_v35, 0.0  ;;  %v2471_v62 = vadd.f32 %v5052_v6, %v2448_v47  ;;  %v2378_v32 = vpop.f32.mrf.mxu0 }
 0x198   : > { %v2171_v8 = vpop.f32.mrf.mxu1  ;;  %v2038_v0 = vadd.f32 %v5026_v13, %v1768_v20  ;;  %v2041_v21 = vadd.f32 %v5031_v55, %v1771_v5  ;;  %v1770_v31 = vadd.f32 %v5035_v53, %v4985_v1  ;;  %v1772_v13 = vadd.f32 %v5039_v18, %v4988_v38 }
 0x199   : > { %v2497_v50 = vcombine.low %v2481_v48, %v2485_v37  ;;  %v2498_v40 = vcombine.high %v2481_v48, %v2485_v37  ;;  %v2487_v59 = vmax.f32 %v2471_v62, 0.0  ;;  %v2242_v9 = vadd.f32 %v2171_v8, %v5015_v19  ;;  %v3770_v11 = vpop.f32.mrf.mxu0 }
 0x19a   : > { %v3732_v28 = vpop.f32.mrf.mxu1  ;;  %v5104_v41 = vrot.slane %v2633_v27, %v5070_v33 }
 0x19b   : > { %v2513_v44 = vcombine.low %v2483_v7, %v2487_v59  ;;  %v2514_v63 = vcombine.high %v2483_v7, %v2487_v59  ;;  %v2449_v24 = vadd.f32 %v2378_v32, %v2242_v9  ;;  %v2387_v51 = vpop.f32.mrf.mxu0  ;;  %v5073_v46 = vrot.slane %v2497_v50, %v5070_v33 }
 0x19c   : > { %v2180_v39 = vpop.f32.mrf.mxu1  ;;  %v5076_v19 = vrot.slane %v2498_v40, %v5070_v33  ;;  %v2244_v25 = vadd.f32 %v3732_v28, %v5022_v56  ;;  %v5107_v56 = vrot.slane %v2634_v57, %v5070_v33  ;;  %v2040_v9 = vadd.f32 %v5037_v17, %v1770_v31 }
 0x19d   : > { %v5079_v12 = vrot.slane %v2513_v44, %v5070_v33  ;;  %v5082_v60 = vrot.slane %v2514_v63, %v5070_v33  ;;  %v2472_v45 = vadd.f32 %v5052_v6, %v2449_v24  ;;  %v3773_v26 = vpop.f32.mrf.mxu0  ;;  %v2243_v48 = vadd.f32 %v2180_v39, %v2036_v42 }
 0x19e   : > { %v3735_v16 = vpop.f32.mrf.mxu1  ;;  %v2451_v55 = vadd.f32 %v3770_v11, %v2244_v25  ;;  %v2042_v11 = vadd.f32 %v5041_v61, %v1772_v13  ;;  %v1773_v61 = vadd.f32 %v5043_v43, %v4991_v52 }
 0x19f   : > { %v2488_v34 = vmax.f32 %v2472_v45, 0.0  ;;  %v2397_v22 = vpop.f32.mrf.mxu0  ;;  %v2562_v3 = vcombine.high %v5073_v46, %v5079_v12  ;;  %v2561_v35 = vcombine.low %v5073_v46, %v5079_v12  ;;  %v2577_v47 = vcombine.low %v5076_v19, %v5082_v60 }
 0x1a0   : > { %v2190_v30 = vpop.f32.mrf.mxu1  ;;  %v2578_v10 = vcombine.high %v5076_v19, %v5082_v60  ;;  %v2450_v50 = vadd.f32 %v2387_v51, %v2243_v48  ;;  %v2245_v1 = vadd.f32 %v3735_v16, %v2038_v0  ;;  %v2474_v49 = vadd.f32 %v5052_v6, %v2451_v55 }
 0x1a1   : > { %v2649_v36 = vcombine.low %v2484_v54, %v2488_v34  ;;  %v2650_v2 = vcombine.high %v2484_v54, %v2488_v34  ;;  %v3776_v23 = vpop.f32.mrf.mxu0  ;;  %v3889_v16 = vmov 1934713408   ;;  %v2043_v52 = vadd.f32 %v5045_v15, %v1773_v61 }
 0x1a2   : > { %v3738_v58 = vpop.f32.mrf.mxu1  ;;  %v2473_v63 = vadd.f32 %v5052_v6, %v2450_v50  ;;  %v2452_v24 = vadd.f32 %v3773_v26, %v2245_v1  ;;  %v2564_v42 = vunpack.c.l.s4 %v3889_v16  ;;  %v2490_v30 = vmax.f32 %v2474_v49, 0.0 }
 0x1a3   : > { %v5110_v37 = vrot.slane %v2649_v36, %v5070_v33  ;;  %v5113_v62 = vrot.slane %v2650_v2, %v5070_v33  ;;  %v2406_v32 = vpop.f32.mrf.mxu0 }
 0x1a4   : > { %v2199_v8 = vpop.f32.mrf.mxu1  ;;  %v2489_v48 = vmax.f32 %v2473_v63, 0.0  ;;  %v2565_v23 = vunpack.c.0.s8 %v2564_v42 }
 0x1a5   : > { %v3779_v27 = vpop.f32.mrf.mxu0  ;;  %v2697_v57 = vcombine.low %v5104_v41, %v5110_v37  ;;  %v2698_v40 = vcombine.high %v5104_v41, %v5110_v37  ;;  %v2713_v7 = vcombine.low %v5107_v56, %v5113_v62  ;;  %v2714_v59 = vcombine.high %v5107_v56, %v5113_v62 }
 0x1a6   : > { %v3741_v53 = vpop.f32.mrf.mxu1  ;;  %v2246_v39 = vadd.f32 %v2199_v8, %v5033_v14  ;;  %v2475_v14 = vadd.f32 %v5052_v6, %v2452_v24 }
 0x1a7   : > { %v2248_v38 = vadd.f32 %v3741_v53, %v2041_v21  ;;  %v2415_v28 = vpop.f32.mrf.mxu0 }
 0x1a8   : > { %v2208_v18 = vpop.f32.mrf.mxu1  ;;  %v2453_v36 = vadd.f32 %v2406_v32, %v2246_v39  ;;  %v2491_v1 = vmax.f32 %v2475_v14, 0.0  ;;  %v2568_v32 = vsub.s32 %v2565_v23, %v3981_v4 }
 0x1a9   : > { %v2455_v29 = vadd.f32 %v3779_v27, %v2248_v38  ;;  %v2247_v44 = vadd.f32 %v2208_v18, %v2040_v9  ;;  %v3782_v45 = vpop.f32.mrf.mxu0 }
 0x1aa   : > { %v3744_v51 = vpop.f32.mrf.mxu1  ;;  %v2476_v9 = vadd.f32 %v5052_v6, %v2453_v36  ;;  %v2576_v24 = vrot.slane %v2562_v3, %v2568_v32  ;;  %v5150_v16 = vrot.slane %v2561_v35, %v2568_v32  ;;  %v2585_v42 = vrot.slane %v2577_v47, %v2568_v32 }
 0x1ab   : > { %v2478_v17 = vadd.f32 %v5052_v6, %v2455_v29  ;;  %v2454_v20 = vadd.f32 %v2415_v28, %v2247_v44  ;;  %v2249_v5 = vadd.f32 %v3744_v51, %v2042_v11  ;;  %v2425_v34 = vpop.f32.mrf.mxu0 }
 0x1ac   : > { %v2218_v54 = vpop.f32.mrf.mxu1  ;;  %v2492_v63 = vmax.f32 %v2476_v9, 0.0 }
 0x1ad   : > { %v2494_v22 = vmax.f32 %v2478_v17, 0.0  ;;  %v2477_v25 = vadd.f32 %v5052_v6, %v2454_v20  ;;  %v2456_v26 = vadd.f32 %v3782_v45, %v2249_v5  ;;  %v3785_v58 = vpop.f32.mrf.mxu0 }
 0x1ae   : > { %v3747_v2 = vpop.f32.mrf.mxu1  ;;  %v2705_v58 = vrot.slane %v2697_v57, %v2568_v32  ;;  %v2728_v57 = vrot.slane %v2714_v59, %v2568_v32 }
 0x1af   : > { %v2665_v0 = vcombine.low %v2490_v30, %v2494_v22  ;;  %v2666_v21 = vcombine.high %v2490_v30, %v2494_v22  ;;  %v2493_v31 = vmax.f32 %v2477_v25, 0.0  ;;  %v2479_v8 = vadd.f32 %v5052_v6, %v2456_v26  ;;  %v2434_v50 = vpop.f32.mrf.mxu0 }
 0x1b0   : > { %v2227_v43 = vpop.f32.mrf.mxu1 }
 0x1b1   : > { %v2529_v13 = vcombine.low %v2489_v48, %v2493_v31  ;;  %v2530_v55 = vcombine.high %v2489_v48, %v2493_v31  ;;  %v2495_v53 = vmax.f32 %v2479_v8, 0.0  ;;  %v2250_v27 = vadd.f32 %v2227_v43, %v2043_v52 }
 0x1b2   : > { %v2673_v54 = vrot.slane %v2665_v0, %v5070_v33  ;;  %v2680_v46 = vrot.slane %v2666_v21, %v5070_v33  ;;  %v2712_v0 = vrot.slane %v2698_v40, %v2568_v32  ;;  %v2721_v31 = vrot.slane %v2713_v7, %v2568_v32 }
 0x1b3   : > { %v2545_v38 = vcombine.low %v2491_v1, %v2495_v53  ;;  %v2546_v18 = vcombine.high %v2491_v1, %v2495_v53  ;;  %v2457_v28 = vadd.f32 %v2434_v50, %v2250_v27  ;;  %v2537_v11 = vrot.slane %v2529_v13, %v5070_v33 }
 0x1b4   : > { %v2544_v49 = vrot.slane %v2530_v55, %v5070_v33 }
 0x1b5   : > { %v2553_v15 = vrot.slane %v2545_v38, %v5070_v33  ;;  %v2560_v29 = vrot.slane %v2546_v18, %v5070_v33  ;;  %v2480_v44 = vadd.f32 %v5052_v6, %v2457_v28  ;;  %v2592_v6 = vrot.slane %v2578_v10, %v2568_v32 }
 0x1b7   : > { %v2496_v39 = vmax.f32 %v2480_v44, 0.0  ;;  %v2594_v4 = vcombine.high %v2537_v11, %v2553_v15  ;;  %v2593_v51 = vcombine.low %v2537_v11, %v2553_v15  ;;  %v2609_v45 = vcombine.low %v2544_v49, %v2560_v29 }
 0x1b8   : > { %v2610_v17 = vcombine.high %v2544_v49, %v2560_v29 }
 0x1b9   : > { %v2681_v20 = vcombine.low %v2492_v63, %v2496_v39  ;;  %v2682_v3 = vcombine.high %v2492_v63, %v2496_v39  ;;  %v2608_v5 = vrot.slane %v2594_v4, %v2568_v32  ;;  %v5158_v61 = vrot.slane %v2593_v51, %v2568_v32 }
 0x1ba   : > { %v2617_v12 = vrot.slane %v2609_v45, %v2568_v32  ;;  %v2624_v35 = vrot.slane %v2610_v17, %v2568_v32 }
 0x1bb   : > { %v2689_v34 = vrot.slane %v2681_v20, %v5070_v33  ;;  %v2696_v47 = vrot.slane %v2682_v3, %v5070_v33  ;;  %v2628_v30 = vcombine.high %v2576_v24, %v2608_v5  ;;  %v2626_v19 = vcombine.high %v5150_v16, %v5158_v61 }
 0x1bc   : > { %v2625_v60 = vcombine.low %v5150_v16, %v5158_v61  ;;  %v2629_v10 = vcombine.low %v2585_v42, %v2617_v12  ;;  %v2627_v22 = vcombine.low %v2576_v24, %v2608_v5  ;;  %v2631_v25 = vcombine.low %v2592_v6, %v2624_v35 }
 0x1bd   : > { %2778 = vrot.lane.b32.xlu1 %v2628_v30, %s3890_s12  ;;  %2770 = vrot.lane.b32.xlu0 %v2626_v19, %s3891_s13  ;;  %v2630_v26 = vcombine.high %v2585_v42, %v2617_v12  ;;  %v2632_v48 = vcombine.high %v2592_v6, %v2624_v35  ;;  %v2729_v14 = vcombine.low %v2673_v54, %v2689_v34  ;;  %s282_s13 = scalar_lea.vmem %s5205_s4, %s2980_s10 }
 0x1be   : > { %v2730_v36 = vcombine.high %v2673_v54, %v2689_v34  ;;  %v2745_v2 = vcombine.low %v2680_v46, %v2696_v47  ;;  %v2746_v33 = vcombine.high %v2680_v46, %v2696_v47 }
 0x1bf   : > { %v2737_v23 = vrot.slane %v2729_v14, %v2568_v32 }
 0x1c0   : > { %v2744_v21 = vrot.slane %v2730_v36, %v2568_v32  ;;  %v2753_v8 = vrot.slane %v2745_v2, %v2568_v32  ;;  %v2760_v52 = vrot.slane %v2746_v33, %v2568_v32 }
 0x1c1   : > { %2782 = vrot.lane.b32.xlu1 %v2629_v10, %s3892_s14  ;;  %2774 = vrot.lane.b32.xlu0 %v2627_v22, %s3893_s22  ;;  %v2761_v43 = vcombine.low %v2705_v58, %v2737_v23  ;;  %v2762_v13 = vcombine.high %v2705_v58, %v2737_v23 }
 0x1c2   : > { %v2763_v55 = vcombine.low %v2712_v0, %v2744_v21  ;;  %v2764_v41 = vcombine.high %v2712_v0, %v2744_v21  ;;  %v2765_v37 = vcombine.low %v2721_v31, %v2753_v8  ;;  %v2766_v40 = vcombine.high %v2721_v31, %v2753_v8 }
 0x1c3   : > { %v2767_v50 = vcombine.low %v2728_v57, %v2760_v52  ;;  %v2768_v1 = vcombine.high %v2728_v57, %v2760_v52 }
 0x1c5   : > { %2790 = vrot.lane.b32.xlu1 %v2631_v25, %s3894_s23  ;;  %2786 = vrot.lane.b32.xlu0 %v2630_v26, %s3895_s24 }
 0x1c9   : > { %2794 = vrot.lane.b32.xlu0 %v2632_v48, %s3896_s25  ;;  %2798 = vrot.lane.b32.xlu1 %v2761_v43, %s3897_s26 }
 0x1cd   : > { %2802 = vrot.lane.b32.xlu0 %v2762_v13, %s3898_s27  ;;  %2806 = vrot.lane.b32.xlu1 %v2763_v55, %s3899_s28 }
 0x1d1   : > { %2810 = vrot.lane.b32.xlu0 %v2764_v41, %s3900_s29  ;;  %2814 = vrot.lane.b32.xlu1 %v2765_v37, %s3901_s30 }
 0x1d5   : > { %2818 = vrot.lane.b32.xlu0 %v2766_v40, %s3902_s5  ;;  %2822 = vrot.lane.b32.xlu1 %v2767_v50, %s3903_s6 }
 0x1d9   : > { %2826 = vrot.lane.b32.xlu0 %v2768_v1, %s3904_s7 }
 0x22f   : > { %v2779_v56 = vpop.permute.xlu1 %2778  ;;  %v2771_v62 = vpop.permute.xlu0 %2770 }
 0x230   : > { %v2830_v7 = vsel %vm2829_vm4, %v2625_v60, %v2771_v62 }
 0x233   : > { %v2783_v59 = vpop.permute.xlu1 %2782  ;;  %v2775_v53 = vpop.permute.xlu0 %2774 }
 0x234   : > { %v2832_v27 = vsel %vm2831_vm5, %v2830_v7, %v2775_v53 }
 0x235   : > { %v2834_v9 = vsel %vm2833_vm6, %v2832_v27, %v2779_v56 }
 0x236   : > { %v2836_v32 = vsel %vm2835_vm7, %v2834_v9, %v2783_v59 }
 0x237   : > { %v2791_v38 = vpop.permute.xlu1 %2790  ;;  %v2787_v18 = vpop.permute.xlu0 %2786 }
 0x238   : > { %v2838_v28 = vsel %vm2837_vm8, %v2836_v32, %v2787_v18 }
 0x239   : > { %v2840_v49 = vsel %vm2839_vm9, %v2838_v28, %v2791_v38 }
 0x23b   : > { %v2795_v11 = vpop.permute.xlu0 %2794  ;;  %v2799_v15 = vpop.permute.xlu1 %2798 }
 0x23c   : > { %v2842_v29 = vsel %vm2841_vm10, %v2840_v49, %v2795_v11 }
 0x23d   : > { %v2844_v44 = vsel %vm2843_vm11, %v2842_v29, %v2799_v15 }
 0x23f   : > { %v2803_v63 = vpop.permute.xlu0 %2802  ;;  %v2807_v24 = vpop.permute.xlu1 %2806 }
 0x240   : > { %v2846_v39 = vsel %vm2845_vm12, %v2844_v44, %v2803_v63 }
 0x241   : > { %v2848_v4 = vsel %vm2847_vm13, %v2846_v39, %v2807_v24 }
 0x243   : > { %v2811_v51 = vpop.permute.xlu0 %2810  ;;  %v2815_v45 = vpop.permute.xlu1 %2814 }
 0x244   : > { %v2850_v16 = vsel %vm2849_vm14, %v2848_v4, %v2811_v51 }
 0x245   : > { %v2852_v42 = vsel %vm2851_vm15, %v2850_v16, %v2815_v45 }
 0x247   : > { %v2819_v6 = vpop.permute.xlu0 %2818  ;;  %v2823_v20 = vpop.permute.xlu1 %2822 }
 0x248   : > { %v2854_v17 = vsel %vm2853_vm0, %v2852_v42, %v2819_v6 }
 0x249   : > { %v2856_v3 = vsel %vm2855_vm1, %v2854_v17, %v2823_v20 }
 0x24b   : > { %v2827_v5 = vpop.permute.xlu0 %2826 }
 0x24c   : > { %v2858_v61 = vsel %vm2857_vm2, %v2856_v3, %v2827_v5 }
 0x24d   : > { %2859 = vst [vmem:[%s282_s13] sm:$0xff] %v2858_v61 }
 0x24e PF: > { %s14_s19 = sadd.s32 1, %s3886_s19   ;;  %s5275_s15 = smov %s3878_s17 }
 0x24f   : > { %p11_p9 = scmp.ge.s32.totalorder %s14_s19, 6   ;;  %s5276_s16 = smov %s3882_s18 }
 0x250   : > { %s5277_s17 = smov %s5280_s20  ;;  %s5278_s18 = smov %s5284_s21 }
 0x251   :  { %13 = sbr.rel (!%p11_p9) target bundleno = 3 (0x3), region = 77 }

</bundles_post_ra>
